<compile_context>
chip_gen: v6e
topology: v6e:2x2x1
jax: 0.10.0
libtpu: 0.0.40
codegen_flags: <defaults>
</compile_context>

<pallas_src>
import functools

import jax
import jax.numpy as jnp
from jax import lax
from jax.experimental import pallas as pl
from jax.experimental.pallas import tpu as pltpu


def _fire_kernel(x_ref, w1_ref, s1_ref, b1_ref, wa_ref, ba_ref, w33_ref,
                 bb_ref, *rest, H, W, Cmid, Chalf, skip):
    if skip:
        xres_ref, out_ref, hpad_ref = rest
    else:
        out_ref, hpad_ref = rest
        xres_ref = None

    Cin = x_ref.shape[-1]
    xz = x_ref[0].reshape(H * W, Cin)              # (H*W, Cin), bf16

    # ---- branch A (conv_1x1): bn1 / conv_1x1 / bn2-scale / skip all folded ----
    ya = jnp.dot(xz, wa_ref[...], preferred_element_type=jnp.float32)
    ya = jnp.maximum(ya + ba_ref[...], 0.0)        # (H*W, Chalf) f32
    out_ref[0:1, :, :, 0:Chalf] = ya.reshape(1, H, W, Chalf)

    # ---- squeeze conv1 (1x1) + bn1, needed only by the depthwise branch ----
    h = jnp.dot(xz, w1_ref[...], preferred_element_type=jnp.float32)
    h = h * s1_ref[...] + b1_ref[...]              # (H*W, Cmid) f32

    # ---- branch B: depthwise 3x3, padding=1 (bn2 scale folded into w33) ----
    # H-padded scratch: rows 1..H hold h, rows 0 and H+1 stay zero.  The border
    # is re-zeroed every step (2 tiny aligned stores) so the kernel stays
    # correct when the "parallel" batch axis is split across TensorCores.
    zrow = jnp.zeros((1, W, Cmid), jnp.float32)
    hpad_ref[0:1, :, :] = zrow
    hpad_ref[H + 1:H + 2, :, :] = zrow
    hpad_ref[1:H + 1, :, :] = h.reshape(H, W, Cmid)   # aligned full-width store

    w33 = w33_ref[...]                             # (9, Cmid) f32, hoisted
    col = lax.broadcasted_iota(jnp.int32, (H * W, Cmid), 0) % W
    has_left = col > 0                             # x-1 tap is in-bounds
    has_right = col < (W - 1)                      # x+1 tap is in-bounds

    acc = None
    for ky in range(3):                            # static unroll (LLO-visible)
        # rows ky..ky+H-1 of the padded buffer == h[y + ky - 1]; aligned load.
        slab = hpad_ref[ky:ky + H, :, :].reshape(H * W, Cmid)
        # column shifts on the XLU; wrapped elements are masked back to the
        # zero-padding value.
        left = jnp.where(has_left, pltpu.roll(slab, 1, 0), 0.0)
        right = jnp.where(has_right, pltpu.roll(slab, H * W - 1, 0), 0.0)
        term = (left * w33[ky * 3 + 0] + slab * w33[ky * 3 + 1]
                + right * w33[ky * 3 + 2])
        acc = term if acc is None else acc + term

    yb = acc + bb_ref[...]
    if skip:
        yb = yb + xres_ref[0].reshape(H * W, Chalf).astype(jnp.float32)
    yb = jnp.maximum(yb, 0.0)
    out_ref[0:1, :, :, Chalf:] = yb.reshape(1, H, W, Chalf)


def fire_module_forward(x, w1, s1, b1, w11, w33, s2, b2, *, stride=1):
    """fire_module forward (inference-mode BatchNorm folded to scale/bias).

    x:   (N, H, W, Cin)  NHWC activations
    w1:  (Cin, Cmid)     conv1 1x1 weight           (Cmid = out_dim // sr)
    w11: (Cmid, Chalf)   conv_1x1 weight            (Chalf = out_dim // 2)
    w33: (9, Cmid)       conv_3x3 depthwise weight, index ky*3+kx
    s1,b1 / s2,b2:       bn1 / bn2 folded per-channel scale / bias
    """
    # TODO(synk): stride=2 and sr != 2 (grouped, non-depthwise 3x3) not implemented.
    assert stride == 1, "only stride=1 supported in this kernel"
    N, H, W, Cin = x.shape
    Cmid = w1.shape[1]
    Chalf = w11.shape[1]
    Cout = 2 * Chalf
    assert Chalf == Cmid, "kernel assumes sr=2 (depthwise 3x3 branch)"
    skip = (stride == 1) and (Cin == Cout)

    f32 = jnp.float32
    s1 = s1.reshape(1, Cmid).astype(f32)
    b1 = b1.reshape(1, Cmid).astype(f32)
    s2 = s2.reshape(Cout).astype(f32)
    b2 = b2.reshape(Cout).astype(f32)
    s2a, s2b = s2[:Chalf], s2[Chalf:]
    b2a, b2b = b2[:Chalf], b2[Chalf:]

    # Fold bn1 + conv_1x1 + bn2-scale (+ skip identity) into one matmul:
    #   a = x @ [ (w1*s1) @ w11 * s2a (+ I) ] + [ (b1 @ w11)*s2a + b2a ]
    wa = ((w1.astype(f32) * s1) @ w11.astype(f32)) * s2a[None, :]
    ba = ((b1[0] @ w11.astype(f32)) * s2a + b2a).reshape(1, Chalf)
    if skip:
        wa = wa + jnp.eye(Cin, Chalf, dtype=f32)
    # Fold the second-half bn2 scale into the depthwise weights.
    w33_eff = w33.astype(f32) * s2b[None, :]
    bb = b2b.reshape(1, Chalf)

    # bf16 at the pallas_call boundary for the MXU matmuls (f32 accumulation).
    bf16 = jnp.bfloat16
    x_bf = x.astype(bf16)
    w1_bf = w1.astype(bf16)
    wa_bf = wa.astype(bf16)

    args = [x_bf, w1_bf, s1, b1, wa_bf, ba, w33_eff, bb]
    in_specs = [
        pl.BlockSpec((1, H, W, Cin), lambda n: (n, 0, 0, 0)),
        pl.BlockSpec((Cin, Cmid), lambda n: (0, 0)),
        pl.BlockSpec((1, Cmid), lambda n: (0, 0)),
        pl.BlockSpec((1, Cmid), lambda n: (0, 0)),
        pl.BlockSpec((Cin, Chalf), lambda n: (0, 0)),
        pl.BlockSpec((1, Chalf), lambda n: (0, 0)),
        pl.BlockSpec((9, Cmid), lambda n: (0, 0)),
        pl.BlockSpec((1, Chalf), lambda n: (0, 0)),
    ]
    if skip:
        # Residual for branch B needs x's second channel half; slice it in the
        # wrapper so the kernel never does a lane-offset slice of the input.
        args.append(x_bf[..., Chalf:])
        in_specs.append(pl.BlockSpec((1, H, W, Chalf), lambda n: (n, 0, 0, 0)))

    kernel = functools.partial(_fire_kernel, H=H, W=W, Cmid=Cmid, Chalf=Chalf,
                               skip=skip)
    # TODO(synk): for production H/W/Cmid add row-block tiling (+1-row halo),
    # set vmem_limit_bytes for v7x's 64 MiB VMEM, and pad channels to a
    # multiple of 128 for lane-dense stores.
    return pl.pallas_call(
        kernel,
        out_shape=jax.ShapeDtypeStruct((N, H, W, Cout), jnp.float32),
        grid_spec=pltpu.PrefetchScalarGridSpec(
            num_scalar_prefetch=0,
            grid=(N,),
            in_specs=in_specs,
            out_specs=pl.BlockSpec((1, H, W, Cout), lambda n: (n, 0, 0, 0)),
            scratch_shapes=[pltpu.VMEM((H + 2, W, Cmid), jnp.float32)],
        ),
        compiler_params=pltpu.CompilerParams(
            dimension_semantics=("parallel",)),
    )(*args)


def fire_module_ref(x, w1, s1, b1, w11, w33, s2, b2, *, stride=1):
    """Pure-JAX f32 reference (lax.conv) mirroring the PyTorch forward."""
    N, H, W, Cin = x.shape
    Cmid = w1.shape[1]
    Chalf = w11.shape[1]
    dn = ("NHWC", "HWIO", "NHWC")
    h = lax.conv_general_dilated(x, w1.reshape(1, 1, Cin, Cmid), (1, 1),
                                 "VALID", dimension_numbers=dn)
    h = h * s1.reshape(1, 1, 1, Cmid) + b1.reshape(1, 1, 1, Cmid)
    a = lax.conv_general_dilated(h, w11.reshape(1, 1, Cmid, Chalf),
                                 (stride, stride), "VALID",
                                 dimension_numbers=dn)
    w3 = w33.reshape(3, 3, Cmid)[:, :, None, :]          # HWIO, I=1 (depthwise)
    b = lax.conv_general_dilated(h, w3, (stride, stride), "SAME",
                                 dimension_numbers=dn,
                                 feature_group_count=Cmid)
    conv2 = jnp.concatenate([a, b], axis=-1)
    y = conv2 * s2.reshape(1, 1, 1, -1) + b2.reshape(1, 1, 1, -1)
    if stride == 1 and Cin == 2 * Chalf:
        y = y + x
    return jnp.maximum(y, 0.0)


def _fold_bn(gamma, beta, running_mean, running_var, eps=1e-5):
    scale = gamma / jnp.sqrt(running_var + eps)
    bias = beta - running_mean * scale
    return scale, bias


def _run_case(key, *, N, H, W, inp_dim, out_dim, sr, stride):
    Cmid = out_dim // sr
    Chalf = out_dim // 2
    ks = jax.random.split(key, 12)
    x = jax.random.normal(ks[0], (N, H, W, inp_dim), jnp.float32)

    w1 = 0.3 * jax.random.normal(ks[1], (inp_dim, Cmid), jnp.float32)
    w11 = 0.3 * jax.random.normal(ks[2], (Cmid, Chalf), jnp.float32)
    w33 = 0.3 * jax.random.normal(ks[3], (9, Cmid), jnp.float32)  # [ky*3+kx, c]

    g1 = 1.0 + 0.1 * jax.random.normal(ks[4], (Cmid,), jnp.float32)
    be1 = 0.1 * jax.random.normal(ks[5], (Cmid,), jnp.float32)
    rm1 = 0.1 * jax.random.normal(ks[6], (Cmid,), jnp.float32)
    rv1 = jnp.abs(1.0 + 0.1 * jax.random.normal(ks[7], (Cmid,), jnp.float32))
    s1, b1 = _fold_bn(g1, be1, rm1, rv1)

    g2 = 1.0 + 0.1 * jax.random.normal(ks[8], (out_dim,), jnp.float32)
    be2 = 0.1 * jax.random.normal(ks[9], (out_dim,), jnp.float32)
    rm2 = 0.1 * jax.random.normal(ks[10], (out_dim,), jnp.float32)
    rv2 = jnp.abs(1.0 + 0.1 * jax.random.normal(ks[11], (out_dim,), jnp.float32))
    s2, b2 = _fold_bn(g2, be2, rm2, rv2)

    out = fire_module_forward(x, w1, s1, b1, w11, w33, s2, b2, stride=stride)
    out = jax.block_until_ready(out)
    ref = fire_module_ref(x, w1, s1, b1, w11, w33, s2, b2, stride=stride)
    assert out.shape == (N, H, W, out_dim)
    max_err = float(jnp.max(jnp.abs(out - ref)))
    # Tolerance sized for bf16 activations/weights vs. the pure-f32 reference.
    assert max_err < 7e-2, f"mismatch vs reference: {max_err}"
    return max_err


if __name__ == "__main__":
    key = jax.random.PRNGKey(0)
    k1, k2 = jax.random.split(key)
    # skip connection active (inp_dim == out_dim)
    _run_case(k1, N=2, H=16, W=16, inp_dim=4, out_dim=4, sr=2, stride=1)
    # no skip connection (inp_dim != out_dim)
    _run_case(k2, N=1, H=16, W=16, inp_dim=8, out_dim=4, sr=2, stride=1)
    print("KERNEL_OK")
</pallas_src>

<mosaic_0001>
module attributes {stable_mosaic.version = 11 : i64} {
  func.func @_fire_kernel(%arg0: i32, %arg1: memref<1x16x16x4xbf16, #tpu.memory_space<vmem>>, %arg2: memref<4x2xbf16, #tpu.memory_space<vmem>>, %arg3: memref<1x2xf32, #tpu.memory_space<vmem>>, %arg4: memref<1x2xf32, #tpu.memory_space<vmem>>, %arg5: memref<4x2xbf16, #tpu.memory_space<vmem>>, %arg6: memref<1x2xf32, #tpu.memory_space<vmem>>, %arg7: memref<9x2xf32, #tpu.memory_space<vmem>>, %arg8: memref<1x2xf32, #tpu.memory_space<vmem>>, %arg9: memref<1x16x16x2xbf16, #tpu.memory_space<vmem>>, %arg10: memref<1x16x16x4xf32, #tpu.memory_space<vmem>>, %arg11: memref<18x16x2xf32, #tpu.memory_space<vmem>>) attributes {dimension_semantics = [#tpu.dimension_semantics<parallel>], iteration_bounds = array<i64: 2>, scalar_prefetch = 0 : i64, scratch_operands = 1 : i64, tpu.core_type = #tpu.core_type<tc>, window_params = [{transform_indices = @transform_0, window_bounds = array<i64: 1, 16, 16, 4>}, {pipeline_mode = #tpu.pipeline_mode<synchronous>, transform_indices = @transform_1, window_bounds = array<i64: 4, 2>}, {pipeline_mode = #tpu.pipeline_mode<synchronous>, transform_indices = @transform_2, window_bounds = array<i64: 1, 2>}, {pipeline_mode = #tpu.pipeline_mode<synchronous>, transform_indices = @transform_3, window_bounds = array<i64: 1, 2>}, {pipeline_mode = #tpu.pipeline_mode<synchronous>, transform_indices = @transform_4, window_bounds = array<i64: 4, 2>}, {pipeline_mode = #tpu.pipeline_mode<synchronous>, transform_indices = @transform_5, window_bounds = array<i64: 1, 2>}, {pipeline_mode = #tpu.pipeline_mode<synchronous>, transform_indices = @transform_6, window_bounds = array<i64: 9, 2>}, {pipeline_mode = #tpu.pipeline_mode<synchronous>, transform_indices = @transform_7, window_bounds = array<i64: 1, 2>}, {transform_indices = @transform_8, window_bounds = array<i64: 1, 16, 16, 2>}, {transform_indices = @transform_9, window_bounds = array<i64: 1, 16, 16, 4>}]} {
    %c0 = arith.constant 0 : index
    %c0_0 = arith.constant 0 : index
    %c0_1 = arith.constant 0 : index
    %c0_2 = arith.constant 0 : index
    %0 = vector.load %arg1[%c0, %c0_0, %c0_1, %c0_2] : memref<1x16x16x4xbf16, #tpu.memory_space<vmem>>, vector<1x16x16x4xbf16>
    %1 = vector.shape_cast %0 : vector<1x16x16x4xbf16> to vector<16x16x4xbf16>
    %2 = vector.shape_cast %1 : vector<16x16x4xbf16> to vector<256x4xbf16>
    %c0_3 = arith.constant 0 : index
    %c0_4 = arith.constant 0 : index
    %3 = vector.load %arg5[%c0_3, %c0_4] : memref<4x2xbf16, #tpu.memory_space<vmem>>, vector<4x2xbf16>
    %cst = arith.constant dense<0.000000e+00> : vector<256x2xf32>
    %4 = tpu.matmul %2, %3, %cst {dimension_numbers = #tpu.dot_dimension_numbers<[1], [0], [0], [1], [0, 0, 1, 1], [], []>} : vector<256x4xbf16>, vector<4x2xbf16>, vector<256x2xf32> -> vector<256x2xf32>
    %c0_5 = arith.constant 0 : index
    %c0_6 = arith.constant 0 : index
    %5 = vector.load %arg6[%c0_5, %c0_6] : memref<1x2xf32, #tpu.memory_space<vmem>>, vector<1x2xf32>
    %6 = vector.broadcast %5 : vector<1x2xf32> to vector<256x2xf32>
    %7 = arith.addf %4, %6 : vector<256x2xf32>
    %cst_7 = arith.constant 0.000000e+00 : f32
    %8 = vector.broadcast %cst_7 : f32 to vector<256x2xf32>
    %9 = arith.maximumf %7, %8 : vector<256x2xf32>
    %10 = vector.shape_cast %9 : vector<256x2xf32> to vector<1x16x16x2xf32>
    %c0_8 = arith.constant 0 : index
    %c0_9 = arith.constant 0 : index
    %c0_10 = arith.constant 0 : index
    %c0_11 = arith.constant 0 : index
    %11 = vector.load %arg10[%c0_8, %c0_9, %c0_10, %c0_11] : memref<1x16x16x4xf32, #tpu.memory_space<vmem>>, vector<1x16x16x2xf32>
    tpu.vector_store %arg10[%c0_8, %c0_9, %c0_10, %c0_11], %10 {strides = array<i32>} : memref<1x16x16x4xf32, #tpu.memory_space<vmem>>, vector<1x16x16x2xf32>,
    %c0_12 = arith.constant 0 : index
    %c0_13 = arith.constant 0 : index
    %12 = vector.load %arg2[%c0_12, %c0_13] : memref<4x2xbf16, #tpu.memory_space<vmem>>, vector<4x2xbf16>
    %cst_14 = arith.constant dense<0.000000e+00> : vector<256x2xf32>
    %13 = tpu.matmul %2, %12, %cst_14 {dimension_numbers = #tpu.dot_dimension_numbers<[1], [0], [0], [1], [0, 0, 1, 1], [], []>} : vector<256x4xbf16>, vector<4x2xbf16>, vector<256x2xf32> -> vector<256x2xf32>
    %c0_15 = arith.constant 0 : index
    %c0_16 = arith.constant 0 : index
    %14 = vector.load %arg3[%c0_15, %c0_16] : memref<1x2xf32, #tpu.memory_space<vmem>>, vector<1x2xf32>
    %15 = vector.broadcast %14 : vector<1x2xf32> to vector<256x2xf32>
    %16 = arith.mulf %13, %15 : vector<256x2xf32>
    %c0_17 = arith.constant 0 : index
    %c0_18 = arith.constant 0 : index
    %17 = vector.load %arg4[%c0_17, %c0_18] : memref<1x2xf32, #tpu.memory_space<vmem>>, vector<1x2xf32>
    %18 = vector.broadcast %17 : vector<1x2xf32> to vector<256x2xf32>
    %19 = arith.addf %16, %18 : vector<256x2xf32>
    %cst_19 = arith.constant 0.000000e+00 : f32
    %20 = vector.broadcast %cst_19 : f32 to vector<1x16x2xf32>
    %c0_20 = arith.constant 0 : index
    %c0_21 = arith.constant 0 : index
    %c0_22 = arith.constant 0 : index
    %21 = vector.load %arg11[%c0_20, %c0_21, %c0_22] : memref<18x16x2xf32, #tpu.memory_space<vmem>>, vector<1x16x2xf32>
    tpu.vector_store %arg11[%c0_20, %c0_21, %c0_22], %20 {strides = array<i32>} : memref<18x16x2xf32, #tpu.memory_space<vmem>>, vector<1x16x2xf32>,
    %c17 = arith.constant 17 : index
    %c0_23 = arith.constant 0 : index
    %c0_24 = arith.constant 0 : index
    %22 = vector.load %arg11[%c17, %c0_23, %c0_24] : memref<18x16x2xf32, #tpu.memory_space<vmem>>, vector<1x16x2xf32>
    tpu.vector_store %arg11[%c17, %c0_23, %c0_24], %20 {strides = array<i32>} : memref<18x16x2xf32, #tpu.memory_space<vmem>>, vector<1x16x2xf32>,
    %23 = vector.shape_cast %19 : vector<256x2xf32> to vector<16x16x2xf32>
    %c1 = arith.constant 1 : index
    %c0_25 = arith.constant 0 : index
    %c0_26 = arith.constant 0 : index
    %24 = vector.load %arg11[%c1, %c0_25, %c0_26] : memref<18x16x2xf32, #tpu.memory_space<vmem>>, vector<16x16x2xf32>
    tpu.vector_store %arg11[%c1, %c0_25, %c0_26], %23 {strides = array<i32>} : memref<18x16x2xf32, #tpu.memory_space<vmem>>, vector<16x16x2xf32>,
    %c0_27 = arith.constant 0 : index
    %c0_28 = arith.constant 0 : index
    %25 = vector.load %arg7[%c0_27, %c0_28] : memref<9x2xf32, #tpu.memory_space<vmem>>, vector<9x2xf32>
    %26 = tpu.iota {dimensions = array<i32: 0>} : vector<256x2xi32>
    %c16_i32 = arith.constant 16 : i32
    %c0_i32 = arith.constant 0 : i32
    %27 = arith.cmpi eq, %c16_i32, %c0_i32 : i32
    %c1_i32 = arith.constant 1 : i32
    %28 = arith.select %27, %c1_i32, %c16_i32 : i32
    %29 = vector.broadcast %28 : i32 to vector<256x2xi32>
    %30 = arith.remsi %26, %29 : vector<256x2xi32>
    %c0_i32_29 = arith.constant 0 : i32
    %31 = vector.broadcast %c0_i32_29 : i32 to vector<256x2xi32>
    %32 = arith.cmpi ne, %30, %31 : vector<256x2xi32>
    %c0_i32_30 = arith.constant 0 : i32
    %33 = vector.broadcast %c0_i32_30 : i32 to vector<256x2xi32>
    %34 = arith.cmpi slt, %30, %33 : vector<256x2xi32>
    %c0_i32_31 = arith.constant 0 : i32
    %35 = arith.cmpi slt, %28, %c0_i32_31 : i32
    %36 = vector.broadcast %35 : i1 to vector<256x2xi1>
    %37 = vector.broadcast %36 : vector<256x2xi1> to vector<256x2xi1>
    %38 = arith.xori %34, %37 : vector<256x2xi1>
    %39 = arith.andi %38, %32 : vector<256x2xi1>
    %40 = vector.broadcast %28 : i32 to vector<256x2xi32>
    %41 = arith.addi %30, %40 : vector<256x2xi32>
    %42 = arith.select %39, %41, %30 : vector<256x2xi1>, vector<256x2xi32>
    %c0_i32_32 = arith.constant 0 : i32
    %43 = vector.broadcast %c0_i32_32 : i32 to vector<256x2xi32>
    %44 = arith.cmpi sgt, %42, %43 : vector<256x2xi32>
    %c15_i32 = arith.constant 15 : i32
    %45 = vector.broadcast %c15_i32 : i32 to vector<256x2xi32>
    %46 = arith.cmpi slt, %42, %45 : vector<256x2xi32>
    %c0_33 = arith.constant 0 : index
    %c0_34 = arith.constant 0 : index
    %c0_35 = arith.constant 0 : index
    %47 = vector.load %arg11[%c0_33, %c0_34, %c0_35] : memref<18x16x2xf32, #tpu.memory_space<vmem>>, vector<16x16x2xf32>
    %48 = vector.shape_cast %47 : vector<16x16x2xf32> to vector<256x2xf32>
    %c1_i32_36 = arith.constant 1 : i32
    %49 = tpu.dynamic_rotate %48 by %c1_i32_36 dim 0 : vector<256x2xf32>, i32 -> vector<256x2xf32>
    %cst_37 = arith.constant 0.000000e+00 : f32
    %50 = vector.broadcast %cst_37 : f32 to vector<256x2xf32>
    %51 = arith.select %44, %49, %50 : vector<256x2xi1>, vector<256x2xf32>
    %c255_i32 = arith.constant 255 : i32
    %52 = tpu.dynamic_rotate %48 by %c255_i32 dim 0 : vector<256x2xf32>, i32 -> vector<256x2xf32>
    %cst_38 = arith.constant 0.000000e+00 : f32
    %53 = vector.broadcast %cst_38 : f32 to vector<256x2xf32>
    %54 = arith.select %46, %52, %53 : vector<256x2xi1>, vector<256x2xf32>
    %55 = vector.extract_strided_slice %25 {offsets = [0, 0], sizes = [1, 2], strides = [1, 1]} : vector<9x2xf32> to vector<1x2xf32>
    %56 = vector.shape_cast %55 : vector<1x2xf32> to vector<2xf32>
    %57 = vector.shape_cast %56 : vector<2xf32> to vector<1x2xf32>
    %58 = vector.broadcast %57 : vector<1x2xf32> to vector<256x2xf32>
    %59 = arith.mulf %51, %58 : vector<256x2xf32>
    %60 = vector.extract_strided_slice %25 {offsets = [1, 0], sizes = [1, 2], strides = [1, 1]} : vector<9x2xf32> to vector<1x2xf32>
    %61 = vector.shape_cast %60 : vector<1x2xf32> to vector<2xf32>
    %62 = vector.shape_cast %61 : vector<2xf32> to vector<1x2xf32>
    %63 = vector.broadcast %62 : vector<1x2xf32> to vector<256x2xf32>
    %64 = arith.mulf %48, %63 : vector<256x2xf32>
    %65 = arith.addf %59, %64 : vector<256x2xf32>
    %66 = vector.extract_strided_slice %25 {offsets = [2, 0], sizes = [1, 2], strides = [1, 1]} : vector<9x2xf32> to vector<1x2xf32>
    %67 = vector.shape_cast %66 : vector<1x2xf32> to vector<2xf32>
    %68 = vector.shape_cast %67 : vector<2xf32> to vector<1x2xf32>
    %69 = vector.broadcast %68 : vector<1x2xf32> to vector<256x2xf32>
    %70 = arith.mulf %54, %69 : vector<256x2xf32>
    %71 = arith.addf %65, %70 : vector<256x2xf32>
    %c1_39 = arith.constant 1 : index
    %c0_40 = arith.constant 0 : index
    %c0_41 = arith.constant 0 : index
    %72 = vector.load %arg11[%c1_39, %c0_40, %c0_41] : memref<18x16x2xf32, #tpu.memory_space<vmem>>, vector<16x16x2xf32>
    %73 = vector.shape_cast %72 : vector<16x16x2xf32> to vector<256x2xf32>
    %c1_i32_42 = arith.constant 1 : i32
    %74 = tpu.dynamic_rotate %73 by %c1_i32_42 dim 0 : vector<256x2xf32>, i32 -> vector<256x2xf32>
    %cst_43 = arith.constant 0.000000e+00 : f32
    %75 = vector.broadcast %cst_43 : f32 to vector<256x2xf32>
    %76 = arith.select %44, %74, %75 : vector<256x2xi1>, vector<256x2xf32>
    %c255_i32_44 = arith.constant 255 : i32
    %77 = tpu.dynamic_rotate %73 by %c255_i32_44 dim 0 : vector<256x2xf32>, i32 -> vector<256x2xf32>
    %cst_45 = arith.constant 0.000000e+00 : f32
    %78 = vector.broadcast %cst_45 : f32 to vector<256x2xf32>
    %79 = arith.select %46, %77, %78 : vector<256x2xi1>, vector<256x2xf32>
    %80 = vector.extract_strided_slice %25 {offsets = [3, 0], sizes = [1, 2], strides = [1, 1]} : vector<9x2xf32> to vector<1x2xf32>
    %81 = vector.shape_cast %80 : vector<1x2xf32> to vector<2xf32>
    %82 = vector.shape_cast %81 : vector<2xf32> to vector<1x2xf32>
    %83 = vector.broadcast %82 : vector<1x2xf32> to vector<256x2xf32>
    %84 = arith.mulf %76, %83 : vector<256x2xf32>
    %85 = vector.extract_strided_slice %25 {offsets = [4, 0], sizes = [1, 2], strides = [1, 1]} : vector<9x2xf32> to vector<1x2xf32>
    %86 = vector.shape_cast %85 : vector<1x2xf32> to vector<2xf32>
    %87 = vector.shape_cast %86 : vector<2xf32> to vector<1x2xf32>
    %88 = vector.broadcast %87 : vector<1x2xf32> to vector<256x2xf32>
    %89 = arith.mulf %73, %88 : vector<256x2xf32>
    %90 = arith.addf %84, %89 : vector<256x2xf32>
    %91 = vector.extract_strided_slice %25 {offsets = [5, 0], sizes = [1, 2], strides = [1, 1]} : vector<9x2xf32> to vector<1x2xf32>
    %92 = vector.shape_cast %91 : vector<1x2xf32> to vector<2xf32>
    %93 = vector.shape_cast %92 : vector<2xf32> to vector<1x2xf32>
    %94 = vector.broadcast %93 : vector<1x2xf32> to vector<256x2xf32>
    %95 = arith.mulf %79, %94 : vector<256x2xf32>
    %96 = arith.addf %90, %95 : vector<256x2xf32>
    %97 = arith.addf %71, %96 : vector<256x2xf32>
    %c2 = arith.constant 2 : index
    %c0_46 = arith.constant 0 : index
    %c0_47 = arith.constant 0 : index
    %98 = vector.load %arg11[%c2, %c0_46, %c0_47] : memref<18x16x2xf32, #tpu.memory_space<vmem>>, vector<16x16x2xf32>
    %99 = vector.shape_cast %98 : vector<16x16x2xf32> to vector<256x2xf32>
    %c1_i32_48 = arith.constant 1 : i32
    %100 = tpu.dynamic_rotate %99 by %c1_i32_48 dim 0 : vector<256x2xf32>, i32 -> vector<256x2xf32>
    %cst_49 = arith.constant 0.000000e+00 : f32
    %101 = vector.broadcast %cst_49 : f32 to vector<256x2xf32>
    %102 = arith.select %44, %100, %101 : vector<256x2xi1>, vector<256x2xf32>
    %c255_i32_50 = arith.constant 255 : i32
    %103 = tpu.dynamic_rotate %99 by %c255_i32_50 dim 0 : vector<256x2xf32>, i32 -> vector<256x2xf32>
    %cst_51 = arith.constant 0.000000e+00 : f32
    %104 = vector.broadcast %cst_51 : f32 to vector<256x2xf32>
    %105 = arith.select %46, %103, %104 : vector<256x2xi1>, vector<256x2xf32>
    %106 = vector.extract_strided_slice %25 {offsets = [6, 0], sizes = [1, 2], strides = [1, 1]} : vector<9x2xf32> to vector<1x2xf32>
    %107 = vector.shape_cast %106 : vector<1x2xf32> to vector<2xf32>
    %108 = vector.shape_cast %107 : vector<2xf32> to vector<1x2xf32>
    %109 = vector.broadcast %108 : vector<1x2xf32> to vector<256x2xf32>
    %110 = arith.mulf %102, %109 : vector<256x2xf32>
    %111 = vector.extract_strided_slice %25 {offsets = [7, 0], sizes = [1, 2], strides = [1, 1]} : vector<9x2xf32> to vector<1x2xf32>
    %112 = vector.shape_cast %111 : vector<1x2xf32> to vector<2xf32>
    %113 = vector.shape_cast %112 : vector<2xf32> to vector<1x2xf32>
    %114 = vector.broadcast %113 : vector<1x2xf32> to vector<256x2xf32>
    %115 = arith.mulf %99, %114 : vector<256x2xf32>
    %116 = arith.addf %110, %115 : vector<256x2xf32>
    %117 = vector.extract_strided_slice %25 {offsets = [8, 0], sizes = [1, 2], strides = [1, 1]} : vector<9x2xf32> to vector<1x2xf32>
    %118 = vector.shape_cast %117 : vector<1x2xf32> to vector<2xf32>
    %119 = vector.shape_cast %118 : vector<2xf32> to vector<1x2xf32>
    %120 = vector.broadcast %119 : vector<1x2xf32> to vector<256x2xf32>
    %121 = arith.mulf %105, %120 : vector<256x2xf32>
    %122 = arith.addf %116, %121 : vector<256x2xf32>
    %123 = arith.addf %97, %122 : vector<256x2xf32>
    %c0_52 = arith.constant 0 : index
    %c0_53 = arith.constant 0 : index
    %124 = vector.load %arg8[%c0_52, %c0_53] : memref<1x2xf32, #tpu.memory_space<vmem>>, vector<1x2xf32>
    %125 = vector.broadcast %124 : vector<1x2xf32> to vector<256x2xf32>
    %126 = arith.addf %123, %125 : vector<256x2xf32>
    %c0_54 = arith.constant 0 : index
    %c0_55 = arith.constant 0 : index
    %c0_56 = arith.constant 0 : index
    %c0_57 = arith.constant 0 : index
    %127 = vector.load %arg9[%c0_54, %c0_55, %c0_56, %c0_57] : memref<1x16x16x2xbf16, #tpu.memory_space<vmem>>, vector<1x16x16x2xbf16>
    %128 = vector.shape_cast %127 : vector<1x16x16x2xbf16> to vector<16x16x2xbf16>
    %129 = vector.shape_cast %128 : vector<16x16x2xbf16> to vector<256x2xbf16>
    %130 = arith.extf %129 : vector<256x2xbf16> to vector<256x2xf32>
    %131 = arith.addf %126, %130 : vector<256x2xf32>
    %cst_58 = arith.constant 0.000000e+00 : f32
    %132 = vector.broadcast %cst_58 : f32 to vector<256x2xf32>
    %133 = arith.maximumf %131, %132 : vector<256x2xf32>
    %134 = vector.shape_cast %133 : vector<256x2xf32> to vector<1x16x16x2xf32>
    %c0_59 = arith.constant 0 : index
    %c0_60 = arith.constant 0 : index
    %c0_61 = arith.constant 0 : index
    %c2_62 = arith.constant 2 : index
    %135 = vector.load %arg10[%c0_59, %c0_60, %c0_61, %c2_62] : memref<1x16x16x4xf32, #tpu.memory_space<vmem>>, vector<1x16x16x2xf32>
    tpu.vector_store %arg10[%c0_59, %c0_60, %c0_61, %c2_62], %134 {strides = array<i32>} : memref<1x16x16x4xf32, #tpu.memory_space<vmem>>, vector<1x16x16x2xf32>,
    return
  }
  func.func @transform_0(%arg0: i32) -> (i32, i32, i32, i32) {
    %c0_i32 = arith.constant 0 : i32
    %c0_i32_0 = arith.constant 0 : i32
    %c0_i32_1 = arith.constant 0 : i32
    %c0_i32_2 = arith.constant 0 : i32
    return %arg0, %c0_i32, %c0_i32_0, %c0_i32_1 : i32, i32, i32, i32
  }
  func.func @transform_1(%arg0: i32) -> (i32, i32) {
    %c0_i32 = arith.constant 0 : i32
    %c0_i32_0 = arith.constant 0 : i32
    %c0_i32_1 = arith.constant 0 : i32
    return %c0_i32, %c0_i32_0 : i32, i32
  }
  func.func @transform_2(%arg0: i32) -> (i32, i32) {
    %c0_i32 = arith.constant 0 : i32
    %c0_i32_0 = arith.constant 0 : i32
    %c0_i32_1 = arith.constant 0 : i32
    return %c0_i32, %c0_i32_0 : i32, i32
  }
  func.func @transform_3(%arg0: i32) -> (i32, i32) {
    %c0_i32 = arith.constant 0 : i32
    %c0_i32_0 = arith.constant 0 : i32
    %c0_i32_1 = arith.constant 0 : i32
    return %c0_i32, %c0_i32_0 : i32, i32
  }
  func.func @transform_4(%arg0: i32) -> (i32, i32) {
    %c0_i32 = arith.constant 0 : i32
    %c0_i32_0 = arith.constant 0 : i32
    %c0_i32_1 = arith.constant 0 : i32
    return %c0_i32, %c0_i32_0 : i32, i32
  }
  func.func @transform_5(%arg0: i32) -> (i32, i32) {
    %c0_i32 = arith.constant 0 : i32
    %c0_i32_0 = arith.constant 0 : i32
    %c0_i32_1 = arith.constant 0 : i32
    return %c0_i32, %c0_i32_0 : i32, i32
  }
  func.func @transform_6(%arg0: i32) -> (i32, i32) {
    %c0_i32 = arith.constant 0 : i32
    %c0_i32_0 = arith.constant 0 : i32
    %c0_i32_1 = arith.constant 0 : i32
    return %c0_i32, %c0_i32_0 : i32, i32
  }
  func.func @transform_7(%arg0: i32) -> (i32, i32) {
    %c0_i32 = arith.constant 0 : i32
    %c0_i32_0 = arith.constant 0 : i32
    %c0_i32_1 = arith.constant 0 : i32
    return %c0_i32, %c0_i32_0 : i32, i32
  }
  func.func @transform_8(%arg0: i32) -> (i32, i32, i32, i32) {
    %c0_i32 = arith.constant 0 : i32
    %c0_i32_0 = arith.constant 0 : i32
    %c0_i32_1 = arith.constant 0 : i32
    %c0_i32_2 = arith.constant 0 : i32
    return %arg0, %c0_i32, %c0_i32_0, %c0_i32_1 : i32, i32, i32, i32
  }
  func.func @transform_9(%arg0: i32) -> (i32, i32, i32, i32) {
    %c0_i32 = arith.constant 0 : i32
    %c0_i32_0 = arith.constant 0 : i32
    %c0_i32_1 = arith.constant 0 : i32
    %c0_i32_2 = arith.constant 0 : i32
    return %arg0, %c0_i32, %c0_i32_0, %c0_i32_1 : i32, i32, i32, i32
  }
}

</mosaic_0001>

<bundles_post_ra>
// kernel: tpu_custom_call.1
= control target key start
LH: loop header
LB: loop body
LE: loop exit
PB: predicated region body
PF: predicated region fallthrough
CT: control target
= control target key end

     0   :  { %s3514_s30 = smov 0   ;;  %s5746_s0 = inlined_call_operand.vmem [shape: bf16[2,16,16,4], index: 0, kind: input, shape index: {}]   ;;  %s5747_s1 = inlined_call_operand.vmem [shape: bf16[4,2], index: 1, kind: input, shape index: {}]   ;;  %s5748_s2 = inlined_call_operand.vmem [shape: f32[1,2], index: 2, kind: input, shape index: {}]   ;;  %s5749_s3 = inlined_call_operand.vmem [shape: f32[1,2], index: 3, kind: input, shape index: {}]   ;;  %s5750_s4 = inlined_call_operand.vmem [shape: bf16[4,2], index: 4, kind: input, shape index: {}]   ;;  %s5751_s5 = inlined_call_operand.vmem [shape: f32[1,2], index: 5, kind: input, shape index: {}]   ;;  %s5752_s6 = inlined_call_operand.vmem [shape: f32[9,2], index: 6, kind: input, shape index: {}]   ;;  %s5753_s7 = inlined_call_operand.vmem [shape: f32[1,2], index: 7, kind: input, shape index: {}]   ;;  %s5754_s8 = inlined_call_operand.vmem [shape: bf16[2,16,16,2], index: 8, kind: input, shape index: {}]   ;;  %s5755_s9 = inlined_call_operand.vmem [shape: f32[2,16,16,4], index: 9, kind: output, shape index: {}]  }
   0x1 LB: > { %s3167_s10 = sadd.s32 4294967295, %s3460_s30   ;;  %p3171_p0 = scmp.ge.s32.totalorder %s3460_s30, 1  ;;  %s3460_s30 = sphi %s3514_s30, %s19_s30  }
   0x2   : > { %p297_p1 = scmp.lt.s32.totalorder %s3460_s30, 3 }
   0x4   : > { %p298_p2 = pnand %p3171_p0, %p297_p1 }
   0x6   : > { %301 = sbr.rel (%p298_p2) target bundleno = 614 (0x266), region = 56 }
   0xb   : > { %vm523_vm0 = vcmask 1041408   ;;  %v753_v0 = vld [vmem:[%s5747_s1] sm:$0x3]  ;;  %p338_p3 = scmp.lt.s32.totalorder %s3167_s10, 1  ;;  %vm474_vm1 = vcmask 31744   ;;  %vm720_vm2 = vcmask 15360   ;;  %v1036_v21 = vlaneseq }
   0xc   : > { %3418 = vmatprep.subr.msk.bf16.mxu1 %vm523_vm0, %v753_v0  ;;  %v755_v1 = vsel %vm523_vm0, %v753_v0, 0  ;;  %v386_v2 = vld [vmem:[%s5750_s4] sm:$0x3]  ;;  %v3462_v20 = vmov 0.0   ;;  %s3463_s13 = smov 2  }
   0xd   : > { %3384 = vmatpush3.bf16.msra.mxu1 %v755_v1  ;;  %s5951_s10 = smov (!%p338_p3, %s3167_s10), 1  ;;  %3417 = vmatprep.subr.msk.bf16.mxu0 %vm523_vm0, %v386_v2  ;;  %v525_v3 = vsel %vm523_vm0, %v386_v2, 0  ;;  %996 = vst.msk [vmem:[#allocation2] sm:$0xff] %vm720_vm2, %v3462_v20  ;;  %997 = vst.msk [vmem:[#allocation2 + $0x8] sm:$0xff] %vm720_vm2, %v3462_v20  ;;  %v3590_v22 = vshrl.u32 %v1036_v21, 7  ;;  %v1034_v29 = vld [vmem:[%s5752_s6] sm:$0xff] }
   0xe   : > { %3350 = vmatpush3.bf16.msra.mxu0 %v525_v3  ;;  %s3233_s15 = sshll.u32 %s5951_s10, 7  ;;  %999 = vst.msk [vmem:[#allocation2 + $0x110] sm:$0xff] %vm720_vm2, %v3462_v20  ;;  %1000 = vst.msk [vmem:[#allocation2 + $0x118] sm:$0xff] %vm720_vm2, %v3462_v20  ;;  %v3649_v47 = vld [vmem:[%s5748_s2] ss:$0 sm:$0xff]  ;;  %s3235_s26 = sshll.u32 %s5951_s10, 8 }
   0xf   : > { %s3536_s18 = scalar_lea.vmem %s5746_s0, %s3233_s15  ;;  %v1745_v25 = vsub.s32 0, %v3590_v22  ;;  %v1781_v28 = vsub.s32 1, %v3590_v22  ;;  %vm1581_vm3 = vcmp.lt.s32.totalorder %v3590_v22, 1  ;;  %v2177_v33 = vsub.s32 4, %v3590_v22  ;;  %s3626_s23 = scalar_lea.vmem %s5754_s8, %s3233_s15  ;;  %v3674_v59 = vld [vmem:[%s5749_s3] ss:$0 sm:$0xff] }
  0x10   : > { %v3429_v4 = vld [vmem:[%s3536_s18] sm:$0xff]   ;;  %v3430_v5 = vld [vmem:[%s3536_s18 + $0x8] sm:$0xff]   ;;  %v3431_v6 = vld [vmem:[%s3536_s18 + $0x10] sm:$0xff]   ;;  %v2606_v34 = vsub.s32 7, %v3590_v22  ;;  %v3617_v35 = vadd.s32 8, %v3590_v22  ;;  %v1849_v36 = vsub.s32 2, %v3590_v22  ;;  %s5530_s11 = scalar_lea.vmem %s5755_s9, %s3235_s26 }
  0x11   : > { %3385 = vmatprep.mubr.msk.bf16.mxu1 %vm474_vm1, %v3429_v4  ;;  %3351 = vmatprep.mubr.msk.bf16.mxu0 %vm474_vm1, %v3429_v4  ;;  %v3432_v7 = vld [vmem:[%s3536_s18 + $0x18] sm:$0xff]   ;;  %v3433_v8 = vld [vmem:[%s3536_s18 + $0x20] sm:$0xff]   ;;  %v3434_v9 = vld [vmem:[%s3536_s18 + $0x28] sm:$0xff]   ;;  %v3604_v30 = vrot.slane %v1034_v29, %v1745_v25  ;;  %v3612_v32 = vrot.slane %v1034_v29, %v1781_v28  ;;  %v2570_v37 = vsub.s32 6, %v3590_v22  ;;  %v2141_v40 = vsub.s32 3, %v3590_v22 }
  0x12   : > { %3386 = vmatmul.mubr.msk.bf16.vlgmr.msra.gmra.mxu1 %vm474_vm1, %v3430_v5  ;;  %3352 = vmatmul.mubr.msk.bf16.vlgmr.msra.gmra.mxu0 %vm474_vm1, %v3430_v5  ;;  %v3435_v10 = vld [vmem:[%s3536_s18 + $0x30] sm:$0xff]   ;;  %v3436_v11 = vld [vmem:[%s3536_s18 + $0x38] sm:$0xff]   ;;  %v3437_v12 = vld [vmem:[%s3536_s18 + $0x40] sm:$0xff]   ;;  %v3633_v41 = vadd.s32 16, %v3590_v22  ;;  %v2245_v42 = vsub.s32 5, %v3590_v22  ;;  %v3637_v43 = vadd.s32 32, %v3590_v22  ;;  %v3639_v44 = vrot.slane %v1034_v29, %v2177_v33 }
  0x13   : > { %3389 = vmatprep.mubr.msk.bf16.mxu1 %vm474_vm1, %v3431_v6  ;;  %3355 = vmatprep.mubr.msk.bf16.mxu0 %vm474_vm1, %v3431_v6  ;;  %v3438_v13 = vld [vmem:[%s3536_s18 + $0x48] sm:$0xff]   ;;  %v3439_v14 = vld [vmem:[%s3536_s18 + $0x50] sm:$0xff]   ;;  %v3440_v15 = vld [vmem:[%s3536_s18 + $0x58] sm:$0xff]   ;;  %v3641_v45 = vrot.slane %v1034_v29, %v2606_v34  ;;  %v3644_v46 = vadd.s32 24, %v3590_v22  ;;  %v1080_v48 = vand.u32 15, %v3617_v35  ;;  %v3653_v50 = vrot.slane %v1034_v29, %v1849_v36 }
  0x14   : > { %v3441_v16 = vld [vmem:[%s3536_s18 + $0x60] sm:$0xff]   ;;  %v3442_v17 = vld [vmem:[%s3536_s18 + $0x68] sm:$0xff]   ;;  %v3443_v18 = vld [vmem:[%s3536_s18 + $0x70] sm:$0xff]   ;;  %v3655_v51 = vrot.slane %v1034_v29, %v2570_v37  ;;  %v3662_v54 = vrot.slane %v1034_v29, %v2141_v40  ;;  %v1087_v55 = vand.u32 15, %v3633_v41  ;;  %v3669_v57 = vadd.s32 40, %v3590_v22 }
  0x15   : > { %v3444_v19 = vld [vmem:[%s3536_s18 + $0x78] sm:$0xff]   ;;  %v3592_v23 = vld [vmem:[#allocation2] sm:$0xff]  ;;  %v3594_v24 = vld [vmem:[#allocation2 + $0x8] sm:$0xff]  ;;  %v3676_v60 = vrot.slane %v1034_v29, %v2245_v42  ;;  %v3683_v63 = vadd.s32 48, %v3590_v22  ;;  %v3686_v0 = vadd.s32 56, %v3590_v22  ;;  %v3692_v4 = vadd.s32 64, %v3590_v22 }
  0x16   : > { %5780 = vst [vmem:[#allocation3_spill] sm:$0xff] %v3592_v23  ;;  %5781 = vst [vmem:[#allocation4_spill] sm:$0xff] %v3594_v24  ;;  %v5756_v26 = vrot.slane %v3592_v23, 7  ;;  %v1550_v27 = vrot.slane %v3594_v24, 7  ;;  %v1784_v39 = vmul.f32 %v3612_v32, %v3594_v24  ;;  %v5757_v49 = vrot.slane %v3594_v24, 1  ;;  %v3658_v52 = vld [vmem:[%s3626_s23] sm:$0xff]  }
  0x17   : > { %v3666_v56 = vld [vmem:[%s3626_s23 + $0x8] sm:$0xff]   ;;  %v3680_v62 = vld [vmem:[%s3626_s23 + $0x10] sm:$0xff]   ;;  %v3718_v28 = vld [vmem:[%s3626_s23 + $0x20] sm:$0xff]   ;;  %v3721_v29 = vadd.s32 88, %v3590_v22  ;;  %v3727_v36 = vadd.s32 96, %v3590_v22  ;;  %vm3732_vm4 = vcmp.lt.s32.totalorder %v1080_v48, 15 }
  0x18   : > { %v1612_v31 = vsel %vm1581_vm3, %v5756_v26, %v1550_v27  ;;  %v3737_v40 = vld [vmem:[%s3626_s23 + $0x28] sm:$0xff]   ;;  %v3740_v41 = vadd.s32 104, %v3590_v22  ;;  %v3743_v42 = vadd.s32 112, %v3590_v22  ;;  %vm1678_vm5 = vcmp.lt.s32.totalorder %v3590_v22, 7 }
  0x19   : > { %v1748_v38 = vmul.f32 %v3604_v30, %v1612_v31  ;;  %5784 = vst [vmem:[#allocation5_spill] sm:$0xff] %v3737_v40  ;;  %vm3755_vm6 = vcmp.gt.s32.totalorder %v1087_v55, 0  ;;  %v3764_v6 = vadd.s32 128, %v3590_v22  ;;  %v3773_v55 = vadd.s32 136, %v3590_v22 }
  0x1a   : > { %3390 = vmatmul.mubr.msk.bf16.gmra.mxu1 %vm474_vm1, %v3432_v7  ;;  %3356 = vmatmul.mubr.msk.bf16.gmra.mxu0 %vm474_vm1, %v3432_v7 }
  0x1b   : > { %3393 = vmatprep.mubr.msk.bf16.mxu1 %vm474_vm1, %v3433_v8  ;;  %3359 = vmatprep.mubr.msk.bf16.mxu0 %vm474_vm1, %v3433_v8  ;;  %v3660_v53 = vadd.f32 %v1784_v39, %v1748_v38  ;;  %5789 = vst [vmem:[#allocation8_spill] sm:$0xff] %v3764_v6  ;;  %5791 = vst [vmem:[#allocation10_spill] sm:$0xff] %v3773_v55 }
  0x22   : > { %3394 = vmatmul.mubr.msk.bf16.gmra.mxu1 %vm474_vm1, %v3434_v9  ;;  %3360 = vmatmul.mubr.msk.bf16.gmra.mxu0 %vm474_vm1, %v3434_v9  ;;  %v3698_v9 = vadd.s32 72, %v3590_v22 }
  0x23   : > { %3397 = vmatprep.mubr.msk.bf16.mxu1 %vm474_vm1, %v3435_v10  ;;  %3363 = vmatprep.mubr.msk.bf16.mxu0 %vm474_vm1, %v3435_v10 }
  0x2a   : > { %3398 = vmatmul.mubr.msk.bf16.gmra.mxu1 %vm474_vm1, %v3436_v11  ;;  %3364 = vmatmul.mubr.msk.bf16.gmra.mxu0 %vm474_vm1, %v3436_v11 }
  0x2b   : > { %3401 = vmatprep.mubr.msk.bf16.mxu1 %vm474_vm1, %v3437_v12  ;;  %3367 = vmatprep.mubr.msk.bf16.mxu0 %vm474_vm1, %v3437_v12 }
  0x32   : > { %3402 = vmatmul.mubr.msk.bf16.gmra.mxu1 %vm474_vm1, %v3438_v13  ;;  %3368 = vmatmul.mubr.msk.bf16.gmra.mxu0 %vm474_vm1, %v3438_v13 }
  0x33   : > { %3405 = vmatprep.mubr.msk.bf16.mxu1 %vm474_vm1, %v3439_v14  ;;  %3371 = vmatprep.mubr.msk.bf16.mxu0 %vm474_vm1, %v3439_v14  ;;  %v3705_v14 = vld [vmem:[%s3626_s23 + $0x18] sm:$0xff]  }
  0x3a   : > { %3406 = vmatmul.mubr.msk.bf16.gmra.mxu1 %vm474_vm1, %v3440_v15  ;;  %3372 = vmatmul.mubr.msk.bf16.gmra.mxu0 %vm474_vm1, %v3440_v15 }
  0x3b   : > { %3409 = vmatprep.mubr.msk.bf16.mxu1 %vm474_vm1, %v3441_v16  ;;  %3375 = vmatprep.mubr.msk.bf16.mxu0 %vm474_vm1, %v3441_v16  ;;  %v3786_v16 = vadd.s32 144, %v3590_v22 }
  0x3d   : > { %5792 = vst [vmem:[#allocation11_spill] sm:$0xff] %v3786_v16 }
  0x42   : > { %3410 = vmatmul.mubr.msk.bf16.gmra.mxu1 %vm474_vm1, %v3442_v17  ;;  %3376 = vmatmul.mubr.msk.bf16.gmra.mxu0 %vm474_vm1, %v3442_v17 }
  0x43   : > { %3413 = vmatprep.mubr.msk.bf16.mxu1 %vm474_vm1, %v3443_v18  ;;  %3379 = vmatprep.mubr.msk.bf16.mxu0 %vm474_vm1, %v3443_v18 }
  0x4a   : > { %3414 = vmatmul.mubr.msk.bf16.gmra.mxu1 %vm474_vm1, %v3444_v19  ;;  %3380 = vmatmul.mubr.msk.bf16.gmra.mxu0 %vm474_vm1, %v3444_v19  ;;  %v3711_v19 = vadd.s32 80, %v3590_v22 }
  0xd2   : > { %v3387_v58 = vpop.f32.mrf.mxu1 }
  0xd3   : > { %v927_v1 = vmul.f32 %v3387_v58, %v3649_v47 }
  0xd4   : > { %v791_v5 = vpop.f32.mrf.mxu1 }
  0xd5   : > { %v966_v10 = vadd.f32 %v3674_v59, %v927_v1  ;;  %v925_v11 = vmul.f32 %v3649_v47, %v791_v5  ;;  %v3770_v1 = vld [vmem:[%s3626_s23 + $0x38] sm:$0xff]  }
  0xd6   : > { %v3388_v15 = vpop.f32.mrf.mxu1  ;;  %5790 = vst [vmem:[#allocation9_spill] sm:$0xff] %v3770_v1  ;;  %v5797_v1 = vand.u32 15, %v3637_v43 }
  0xd7   : > { %1004 = vst.msk [vmem:[#allocation2 + $0x20] sm:$0xff] %vm720_vm2, %v966_v10  ;;  %v964_v20 = vadd.f32 %v3674_v59, %v925_v11  ;;  %v928_v21 = vmul.f32 %v3388_v15, %v3649_v47  ;;  %v3750_v10 = vadd.s32 120, %v3590_v22 }
  0xd8   : > { %v794_v31 = vpop.f32.mrf.mxu1  ;;  %vm3868_vm7 = vcmp.gt.s32.totalorder %v5797_v1, 0 }
  0xd9   : > { %1002 = vst.msk [vmem:[#allocation2 + $0x10] sm:$0xff] %vm720_vm2, %v964_v20  ;;  %v967_v37 = vadd.f32 %v3674_v59, %v928_v21  ;;  %v926_v38 = vmul.f32 %v3649_v47, %v794_v31  ;;  %5785 = vst [vmem:[#allocation6_spill] sm:$0xff] %v3750_v10  ;;  %v3761_v31 = vld [vmem:[%s3626_s23 + $0x30] sm:$0xff]  }
  0xda   : > { %v3391_v58 = vpop.f32.mrf.mxu1  ;;  %5788 = vst [vmem:[#allocation7_spill] sm:$0xff] %v3761_v31 }
  0xdb   : > { %1005 = vst.msk [vmem:[#allocation2 + $0x28] sm:$0xff] %vm720_vm2, %v967_v37  ;;  %v965_v11 = vadd.f32 %v3674_v59, %v926_v38  ;;  %v931_v15 = vmul.f32 %v3391_v58, %v3649_v47 }
  0xdc   : > { %v807_v26 = vpop.f32.mrf.mxu1 }
  0xdd   : > { %1003 = vst.msk [vmem:[#allocation2 + $0x18] sm:$0xff] %vm720_vm2, %v965_v11  ;;  %v970_v58 = vadd.f32 %v3674_v59, %v931_v15  ;;  %v929_v21 = vmul.f32 %v3649_v47, %v807_v26 }
  0xde   : > { %v3392_v5 = vpop.f32.mrf.mxu1  ;;  %v3780_v48 = vld [vmem:[#allocation2 + $0x20] sm:$0xff] }
  0xdf   : > { %1008 = vst.msk [vmem:[#allocation2 + $0x40] sm:$0xff] %vm720_vm2, %v970_v58  ;;  %v968_v26 = vadd.f32 %v3674_v59, %v929_v21  ;;  %v932_v11 = vmul.f32 %v3392_v5, %v3649_v47  ;;  %v3795_v38 = vrot.slane %v3780_v48, 7  ;;  %v3809_v17 = vmul.f32 %v3639_v44, %v3780_v48 }
  0xe0   : > { %v810_v34 = vpop.f32.mrf.mxu1  ;;  %v1519_v25 = vld [vmem:[#allocation2 + $0x10] sm:$0xff]  ;;  %v3813_v35 = vmul.f32 %v3780_v48, %v3612_v32 }
  0xe1   : > { %5793 = vst [vmem:[#allocation12_spill] sm:$0xff] %v3795_v38  ;;  %1006 = vst.msk [vmem:[#allocation2 + $0x30] sm:$0xff] %vm720_vm2, %v968_v26  ;;  %v971_v21 = vadd.f32 %v3674_v59, %v932_v11  ;;  %v930_v5 = vmul.f32 %v3649_v47, %v810_v34  ;;  %v1648_v58 = vrot.slane %v1519_v25, 1  ;;  %v3802_v15 = vrot.slane %v1519_v25, 7 }
  0xe2   : > { %v3395_v33 = vpop.f32.mrf.mxu1  ;;  %v3804_v18 = vld [vmem:[#allocation2 + $0x28] sm:$0xff]  ;;  %v1785_v12 = vmul.f32 %v3612_v32, %v1519_v25 }
  0xe3   : > { %5794 = vst [vmem:[#allocation13_spill] sm:$0xff] %v3802_v15  ;;  %1009 = vst.msk [vmem:[#allocation2 + $0x48] sm:$0xff] %vm720_vm2, %v971_v21  ;;  %v969_v34 = vadd.f32 %v3674_v59, %v930_v5  ;;  %v935_v11 = vmul.f32 %v3395_v33, %v3649_v47  ;;  %v1708_v25 = vsel %vm1678_vm5, %v5757_v49, %v1648_v58  ;;  %v3829_v26 = vrot.slane %v3804_v18, 1 }
  0xe4   : > { %v823_v7 = vpop.f32.mrf.mxu1  ;;  %v1712_v13 = vsel %vm3732_vm4, %v1708_v25, 0.0  ;;  %v3826_v2 = vld [vmem:[#allocation2 + $0x18] sm:$0xff]  ;;  %v2609_v21 = vmul.f32 %v3641_v45, %v3804_v18  ;;  %v1611_v33 = vsel %vm1581_vm3, %v1550_v27, %v3802_v15  ;;  %v5796_v24 = vrot.slane %v3804_v18, 7 }
  0xe5   : > { %1007 = vst.msk [vmem:[#allocation2 + $0x38] sm:$0xff] %vm720_vm2, %v969_v34  ;;  %v974_v5 = vadd.f32 %v3674_v59, %v935_v11  ;;  %v933_v25 = vmul.f32 %v3649_v47, %v823_v7  ;;  %v1852_v49 = vmul.f32 %v3653_v50, %v1712_v13  ;;  %v1948_v3 = vrot.slane %v3826_v2, 7 }
  0xe6   : > { %v3396_v37 = vpop.f32.mrf.mxu1  ;;  %v3844_v61 = vrot.slane %v3826_v2, 1  ;;  %v2180_v8 = vmul.f32 %v3639_v44, %v3826_v2  ;;  %v3853_v27 = vsel %vm1581_vm3, %v3795_v38, %v5796_v24  ;;  %v1616_v7 = vsel %vm3755_vm6, %v1611_v33, 0.0 }
  0xe7   : > { %1012 = vst.msk [vmem:[#allocation2 + $0x60] sm:$0xff] %vm720_vm2, %v974_v5  ;;  %v972_v13 = vadd.f32 %v3674_v59, %v933_v25  ;;  %v936_v34 = vmul.f32 %v3396_v37, %v3649_v47  ;;  %v1884_v11 = vadd.f32 %v1852_v49, %v3660_v53  ;;  %v3864_v23 = vsel %vm1581_vm3, %v3802_v15, %v1948_v3 }
  0xe8   : > { %5795 = vst [vmem:[#allocation14_spill] sm:$0xff] %v3844_v61  ;;  %v826_v33 = vpop.f32.mrf.mxu1  ;;  %v5800_v5 = vrot.slane %v3780_v48, 1  ;;  %v2144_v49 = vmul.f32 %v3662_v54, %v3864_v23  ;;  %v3881_v53 = vld [vmem:[#allocation2 + $0x30] sm:$0xff]  ;;  %v2573_v43 = vmul.f32 %v3655_v51, %v3853_v27  ;;  %v1707_v1 = vsel %vm1678_vm5, %v1648_v58, %v3844_v61 }
  0xe9   : > { %1010 = vst.msk [vmem:[#allocation2 + $0x50] sm:$0xff] %vm720_vm2, %v972_v13  ;;  %v975_v25 = vadd.f32 %v3674_v59, %v936_v34  ;;  %v934_v15 = vmul.f32 %v3649_v47, %v826_v33  ;;  %v2474_v16 = vrot.slane %v3881_v53, 1  ;;  %v1749_v40 = vmul.f32 %v3604_v30, %v1616_v7 }
  0xea   : > { %v3877_v37 = vsel %vm1678_vm5, %v3844_v61, %v5800_v5  ;;  %v3399_v55 = vpop.f32.mrf.mxu1  ;;  %v2212_v31 = vadd.f32 %v2180_v8, %v2144_v49  ;;  %v2641_v10 = vadd.f32 %v2609_v21, %v2573_v43  ;;  %v1853_v33 = vmul.f32 %v3653_v50, %v1707_v1  ;;  %v3909_v8 = vld [vmem:[%s5752_s6 + $0x8] ss:$0 sm:$0xff] }
  0xeb   : > { %v2108_v5 = vsel %vm3732_vm4, %v3877_v37, 0.0  ;;  %1013 = vst.msk [vmem:[#allocation2 + $0x68] sm:$0xff] %vm720_vm2, %v975_v25  ;;  %v973_v58 = vadd.f32 %v3674_v59, %v934_v15  ;;  %v939_v13 = vmul.f32 %v3399_v55, %v3649_v47  ;;  %v3903_v34 = vsel %vm1678_vm5, %v3829_v26, %v2474_v16 }
  0xec   : > { %v2248_v6 = vmul.f32 %v3676_v60, %v2108_v5  ;;  %v839_v61 = vpop.f32.mrf.mxu1  ;;  %v2537_v15 = vsel %vm3732_vm4, %v3903_v34, 0.0  ;;  %v1817_v7 = vadd.f32 %v1785_v12, %v1749_v40  ;;  %v2008_v55 = vsel %vm1581_vm3, %v1948_v3, %v3795_v38 }
  0xed   : > { %1011 = vst.msk [vmem:[#allocation2 + $0x58] sm:$0xff] %vm720_vm2, %v973_v58  ;;  %v978_v49 = vadd.f32 %v3674_v59, %v939_v13  ;;  %v937_v43 = vmul.f32 %v3649_v47, %v839_v61  ;;  %v2677_v1 = vmul.f32 %v3909_v8, %v2537_v15  ;;  %v5801_v40 = vrot.slane %v3780_v48, 1 }
  0xee   : > { %v2280_v21 = vadd.f32 %v2248_v6, %v2212_v31  ;;  %v2013_v6 = vsel %vm3755_vm6, %v2008_v55, 0.0  ;;  %v3923_v31 = vld [vmem:[#allocation2 + $0x38] sm:$0xff]  ;;  %v3400_v39 = vpop.f32.mrf.mxu1  ;;  %v1885_v12 = vadd.f32 %v1853_v33, %v1817_v7  ;;  %v5774_v33 = vrot.slane %v3881_v53, 7 }
  0xef   : > { %v2103_v3 = vsel %vm1678_vm5, %v5801_v40, %v3829_v26  ;;  %v2145_v5 = vmul.f32 %v3662_v54, %v2013_v6  ;;  %1016 = vst.msk [vmem:[#allocation2 + $0x80] sm:$0xff] %vm720_vm2, %v978_v49  ;;  %v976_v61 = vadd.f32 %v3674_v59, %v937_v43  ;;  %v940_v58 = vmul.f32 %v3400_v39, %v3649_v47 }
  0xf0   : > { %v2312_v25 = vadd.f32 %v2280_v21, %v1884_v11  ;;  %v2709_v13 = vadd.f32 %v2677_v1, %v2641_v10  ;;  %v2249_v15 = vmul.f32 %v3676_v60, %v2103_v3  ;;  %v842_v38 = vpop.f32.mrf.mxu1  ;;  %v3938_v11 = vld [vmem:[%s5753_s7] ss:$0 sm:$0xff]  ;;  %v5773_v21 = vrot.slane %v3923_v31, 1 }
  0xf1   : > { %v2213_v48 = vadd.f32 %v3809_v17, %v2145_v5  ;;  %v2610_v7 = vmul.f32 %v3641_v45, %v3881_v53  ;;  %1014 = vst.msk [vmem:[#allocation2 + $0x70] sm:$0xff] %vm720_vm2, %v976_v61  ;;  %v979_v10 = vadd.f32 %v3674_v59, %v940_v58  ;;  %v938_v49 = vmul.f32 %v3649_v47, %v842_v38 }
  0xf2   : > { %v2741_v43 = vadd.f32 %v2709_v13, %v2312_v25  ;;  %v2379_v1 = vrot.slane %v3923_v31, 7  ;;  %v5802_v6 = vand.u32 15, %v3644_v46  ;;  %v3403_v39 = vpop.f32.mrf.mxu1  ;;  %v5805_v5 = vrot.slane %v3804_v18, 7 }
  0xf3   : > { %v2281_v40 = vadd.f32 %v2249_v15, %v2213_v48  ;;  %v3967_v38 = vsel %vm1678_vm5, %v2474_v16, %v5773_v21  ;;  %v1618_v46 = vsel %vm3868_vm7, %v2008_v55, 0.0  ;;  %1017 = vst.msk [vmem:[#allocation2 + $0x88] sm:$0xff] %vm720_vm2, %v979_v10  ;;  %v977_v25 = vadd.f32 %v3674_v59, %v938_v49  ;;  %v3988_v21 = vld [vmem:[#allocation2 + $0x40] sm:$0xff] }
  0xf4   : > { %vm3951_vm8 = vcmp.lt.s32.totalorder %v5802_v6, 15  ;;  %v3961_v61 = vsel %vm1581_vm3, %v5805_v5, %v5774_v33  ;;  %v943_v58 = vmul.f32 %v3403_v39, %v3649_v47  ;;  %v2780_v13 = vadd.f32 %v3938_v11, %v2741_v43  ;;  %v855_v48 = vpop.f32.mrf.mxu1 }
  0xf5   : > { %v2442_v15 = vsel %vm3755_vm6, %v3961_v61, 0.0  ;;  %v2313_v6 = vadd.f32 %v2281_v40, %v1885_v12  ;;  %v2678_v5 = vmul.f32 %v3909_v8, %v3967_v38  ;;  %v1751_v55 = vmul.f32 %v3604_v30, %v1618_v46  ;;  %1015 = vst.msk [vmem:[#allocation2 + $0x78] sm:$0xff] %vm720_vm2, %v977_v25 }
  0xf6   : > { %v2574_v16 = vmul.f32 %v3655_v51, %v2442_v15  ;;  %v982_v10 = vadd.f32 %v3674_v59, %v943_v58  ;;  %v941_v49 = vmul.f32 %v3649_v47, %v855_v48  ;;  %v5806_v43 = vunpack.c.h.bf16 %v3658_v52  ;;  %v3404_v12 = vpop.f32.mrf.mxu1 }
  0xf7   : > { %v1855_v20 = vmul.f32 %v2103_v3, %v3653_v50  ;;  %v1819_v15 = vadd.f32 %v3813_v35, %v1751_v55  ;;  %v2015_v46 = vsel %vm3868_vm7, %v3961_v61, 0.0  ;;  %v2183_v25 = vmul.f32 %v3881_v53, %v3639_v44 }
  0xf8   : > { %v2876_v39 = vadd.f32 %v5806_v43, %v2780_v13  ;;  %v2642_v40 = vadd.f32 %v2610_v7, %v2574_v16  ;;  %1020 = vst.msk [vmem:[#allocation2 + $0xa0] sm:$0xff] %vm720_vm2, %v982_v10  ;;  %v980_v58 = vadd.f32 %v3674_v59, %v941_v49  ;;  %v944_v13 = vmul.f32 %v3404_v12, %v3649_v47  ;;  %v4000_v43 = vld [vmem:[#allocation2 + $0x48] sm:$0xff]  ;;  %v858_v7 = vpop.f32.mrf.mxu1 }
  0xf9   : > { %v2147_v48 = vmul.f32 %v3662_v54, %v2015_v46  ;;  %v1887_v16 = vadd.f32 %v1855_v20, %v1819_v15  ;;  %v2251_v55 = vmul.f32 %v3967_v38, %v3676_v60  ;;  %v5776_v33 = vrot.slane %v3988_v21, 7 }
  0xfa   : > { %v2908_v3 = vmax.f32 %v2876_v39, 0.0  ;;  %v2710_v35 = vadd.f32 %v2678_v5, %v2642_v40  ;;  %1018 = vst.msk [vmem:[#allocation2 + $0x90] sm:$0xff] %vm720_vm2, %v980_v58  ;;  %v983_v10 = vadd.f32 %v3674_v59, %v944_v13  ;;  %v942_v49 = vmul.f32 %v3649_v47, %v858_v7  ;;  %v3407_v40 = vpop.f32.mrf.mxu1 }
  0xfb   : > { %v2215_v39 = vadd.f32 %v2183_v25, %v2147_v48  ;;  %v2476_v12 = vrot.slane %v3988_v21, 1  ;;  %v5807_v5 = vand.u32 15, %v3669_v57  ;;  %v4022_v46 = vsel %vm1581_vm3, %v2379_v1, %v5776_v33 }
  0xfc   : > { %2973 = vrot.lane.b32.xlu0 %v2908_v3, %s3463_s13  ;;  %v2742_v15 = vadd.f32 %v2710_v35, %v2313_v6  ;;  %v5775_v25 = vrot.slane %v4000_v43, 1  ;;  %v2612_v58 = vmul.f32 %v3641_v45, %v3988_v21  ;;  %1021 = vst.msk [vmem:[#allocation2 + $0xa8] sm:$0xff] %vm720_vm2, %v983_v10  ;;  %v981_v57 = vadd.f32 %v3674_v59, %v942_v49  ;;  %v871_v7 = vpop.f32.mrf.mxu1 }
  0xfd   : > { %vm4012_vm9 = vcmp.lt.s32.totalorder %v5807_v5, 15  ;;  %v947_v13 = vmul.f32 %v3407_v40, %v3649_v47  ;;  %v2283_v6 = vadd.f32 %v2251_v55, %v2215_v39  ;;  %v2444_v3 = vsel %vm3868_vm7, %v4022_v46, 0.0 }
  0xfe   : > { %v2781_v48 = vadd.f32 %v3938_v11, %v2742_v15  ;;  %v4038_v35 = vsel %vm1678_vm5, %v2476_v12, %v5775_v25  ;;  %v2576_v10 = vmul.f32 %v3655_v51, %v2444_v3  ;;  %v1714_v49 = vsel %vm3951_vm8, %v3877_v37, 0.0  ;;  %1019 = vst.msk [vmem:[#allocation2 + $0x98] sm:$0xff] %vm720_vm2, %v981_v57  ;;  %v3408_v25 = vpop.f32.mrf.mxu1 }
  0xff   : > { %v986_v24 = vadd.f32 %v3674_v59, %v947_v13  ;;  %v945_v55 = vmul.f32 %v3649_v47, %v871_v7  ;;  %v2315_v39 = vadd.f32 %v2283_v6, %v1887_v16  ;;  %v2680_v5 = vmul.f32 %v3909_v8, %v4038_v35 }
 0x100   : > { %v5810_v40 = vunpack.c.l.bf16 %v3666_v56  ;;  %v2644_v33 = vadd.f32 %v2612_v58, %v2576_v10  ;;  %v1750_v3 = vmul.f32 %v3864_v23, %v3604_v30  ;;  %v1786_v37 = vmul.f32 %v3826_v2, %v3612_v32 }
 0x101   : > { %1024 = vst.msk [vmem:[#allocation2 + $0xc0] sm:$0xff] %vm720_vm2, %v986_v24  ;;  %v984_v57 = vadd.f32 %v3674_v59, %v945_v55  ;;  %v948_v16 = vmul.f32 %v3408_v25, %v3649_v47  ;;  %v1854_v13 = vmul.f32 %v3653_v50, %v1714_v49  ;;  %v2110_v6 = vsel %vm3951_vm8, %v3903_v34, 0.0  ;;  %v874_v24 = vpop.f32.mrf.mxu1 }
 0x102   : > { %v2877_v15 = vadd.f32 %v5810_v40, %v2781_v48  ;;  %v5811_v58 = vand.u32 15, %v3683_v63  ;;  %v2712_v2 = vadd.f32 %v2680_v5, %v2644_v33  ;;  %v1818_v7 = vadd.f32 %v1786_v37, %v1750_v3 }
 0x103   : > { %v2146_v10 = vmul.f32 %v3853_v27, %v3662_v54  ;;  %1022 = vst.msk [vmem:[#allocation2 + $0xb0] sm:$0xff] %vm720_vm2, %v984_v57  ;;  %v987_v25 = vadd.f32 %v3674_v59, %v948_v16  ;;  %v2182_v49 = vmul.f32 %v3804_v18, %v3639_v44  ;;  %v2250_v63 = vmul.f32 %v3676_v60, %v2110_v6  ;;  %v3411_v57 = vpop.f32.mrf.mxu1 }
 0x104   : > { %vm4064_vm10 = vcmp.gt.s32.totalorder %v5811_v58, 0  ;;  %v2909_v23 = vmax.f32 %v2877_v15, 0.0  ;;  %v5814_v55 = vrot.slane %v3881_v53, 7  ;;  %v2744_v5 = vadd.f32 %v2712_v2, %v2315_v39 }
 0x105   : > { %v1886_v40 = vadd.f32 %v1854_v13, %v1818_v7  ;;  %v5815_v15 = vrot.slane %v3923_v31, 1  ;;  %1025 = vst.msk [vmem:[#allocation2 + $0xc8] sm:$0xff] %vm720_vm2, %v987_v25  ;;  %v2214_v16 = vadd.f32 %v2182_v49, %v2146_v10  ;;  %v2611_v39 = vmul.f32 %v3641_v45, %v3923_v31 }
 0x106   : > { %v4081_v33 = vsel %vm1581_vm3, %v5814_v55, %v2379_v1  ;;  %2975 = vrot.lane.b32.xlu1 %v2909_v23, %s3463_s13  ;;  %v946_v13 = vmul.f32 %v3649_v47, %v874_v24  ;;  %v2783_v6 = vadd.f32 %v3938_v11, %v2744_v5  ;;  %v951_v58 = vmul.f32 %v3411_v57, %v3649_v47 }
 0x107   : > { %v4088_v3 = vsel %vm1678_vm5, %v5815_v15, %v2476_v12  ;;  %v2575_v37 = vmul.f32 %v3655_v51, %v4081_v33  ;;  %v1716_v23 = vsel %vm4012_vm9, %v3903_v34, 0.0  ;;  %v2282_v2 = vadd.f32 %v2250_v63, %v2214_v16  ;;  %v4114_v15 = vld [vmem:[#allocation2 + $0x50] sm:$0xff] }
 0x108   : > { %v2539_v1 = vsel %vm3951_vm8, %v4088_v3, 0.0  ;;  %v985_v17 = vadd.f32 %v3674_v59, %v946_v13  ;;  %v1752_v10 = vmul.f32 %v3853_v27, %v3604_v30  ;;  %v5816_v25 = vunpack.c.l.bf16 %v3680_v62 }
 0x109   : > { %v2679_v12 = vmul.f32 %v3909_v8, %v2539_v1  ;;  %v2643_v7 = vadd.f32 %v2611_v39, %v2575_v37  ;;  %v990_v49 = vadd.f32 %v3674_v59, %v951_v58  ;;  %v1788_v55 = vmul.f32 %v3804_v18, %v3612_v32 }
 0x10a   : > { %v2879_v24 = vadd.f32 %v5816_v25, %v2783_v6  ;;  %v1856_v5 = vmul.f32 %v3653_v50, %v1716_v23  ;;  %v5817_v34 = vand.u32 15, %v3686_v0  ;;  %v2314_v37 = vadd.f32 %v2282_v2, %v1886_v40  ;;  %1023 = vst.msk [vmem:[#allocation2 + $0xb8] sm:$0xff] %vm720_vm2, %v985_v17  ;;  %v887_v17 = vpop.f32.mrf.mxu1 }
 0x10b   : > { %v2711_v27 = vadd.f32 %v2679_v12, %v2643_v7  ;;  %v2112_v57 = vsel %vm4012_vm9, %v4088_v3, 0.0  ;;  %v2148_v18 = vmul.f32 %v4081_v33, %v3662_v54  ;;  %1028 = vst.msk [vmem:[#allocation2 + $0xe0] sm:$0xff] %vm720_vm2, %v990_v49  ;;  %v1820_v1 = vadd.f32 %v1788_v55, %v1752_v10 }
 0x10c   : > { %vm4118_vm11 = vcmp.lt.s32.totalorder %v5817_v34, 15  ;;  %v2911_v16 = vmax.f32 %v2879_v24, 0.0  ;;  %v2184_v0 = vmul.f32 %v3923_v31, %v3639_v44  ;;  %v2252_v39 = vmul.f32 %v3676_v60, %v2112_v57 }
 0x10d   : > { %v2743_v40 = vadd.f32 %v2711_v27, %v2314_v37  ;;  %v2381_v13 = vrot.slane %v4000_v43, 7  ;;  %v2478_v6 = vrot.slane %v4114_v15, 1  ;;  %v2613_v12 = vmul.f32 %v3641_v45, %v4000_v43 }
 0x10e   : > { %2979 = vrot.lane.b32.xlu0 %v2911_v16, %s3463_s13  ;;  %v1888_v58 = vadd.f32 %v1856_v5, %v1820_v1  ;;  %v2216_v23 = vadd.f32 %v2184_v0, %v2148_v18  ;;  %v1620_v2 = vsel %vm4064_vm10, %v3961_v61, 0.0  ;;  %v1789_v7 = vmul.f32 %v3881_v53, %v3612_v32  ;;  %v4169_v0 = vld [vmem:[#allocation2 + $0x58] sm:$0xff] }
 0x10f   : > { %v2782_v10 = vadd.f32 %v3938_v11, %v2743_v40  ;;  %v5820_v25 = vrot.slane %v3988_v21, 7  ;;  %v5821_v49 = vrot.slane %v4000_v43, 1  ;;  %v1753_v61 = vmul.f32 %v3604_v30, %v1620_v2  ;;  %v3412_v2 = vpop.f32.mrf.mxu1 }
 0x110   : > { %v2284_v5 = vadd.f32 %v2252_v39, %v2216_v23  ;;  %v1857_v37 = vmul.f32 %v3967_v38, %v3653_v50  ;;  %v5822_v27 = vunpack.c.h.bf16 %v3666_v56  ;;  %v2017_v1 = vsel %vm4064_vm10, %v4022_v46, 0.0 }
 0x111   : > { %v4147_v24 = vsel %vm1581_vm3, %v5820_v25, %v2381_v13  ;;  %v4153_v55 = vsel %vm1678_vm5, %v5821_v49, %v2478_v6  ;;  %v1821_v16 = vadd.f32 %v1789_v7, %v1753_v61  ;;  %v5823_v20 = vand.u32 15, %v3692_v4 }
 0x112   : > { %v2541_v53 = vsel %vm4012_vm9, %v4153_v55, 0.0  ;;  %v2577_v34 = vmul.f32 %v3655_v51, %v4147_v24  ;;  %v2878_v57 = vadd.f32 %v5822_v27, %v2782_v10  ;;  %v2316_v40 = vadd.f32 %v2284_v5, %v1888_v58 }
 0x113   : > { %v2681_v18 = vmul.f32 %v3909_v8, %v2541_v53  ;;  %vm4173_vm12 = vcmp.gt.s32.totalorder %v5823_v20, 0  ;;  %v2149_v56 = vmul.f32 %v3662_v54, %v2017_v1  ;;  %v2185_v23 = vmul.f32 %v3988_v21, %v3639_v44 }
 0x114   : > { %v2645_v38 = vadd.f32 %v2613_v12, %v2577_v34  ;;  %v2910_v7 = vmax.f32 %v2878_v57, 0.0  ;;  %v1889_v10 = vadd.f32 %v1857_v37, %v1821_v16  ;;  %v2253_v25 = vmul.f32 %v4038_v35, %v3676_v60 }
 0x115   : > { %v2382_v49 = vrot.slane %v4114_v15, 7  ;;  %v2217_v61 = vadd.f32 %v2185_v23, %v2149_v56  ;;  %v2479_v53 = vrot.slane %v4169_v0, 1  ;;  %v2614_v12 = vmul.f32 %v3641_v45, %v4114_v15 }
 0x116   : > { %v2713_v4 = vadd.f32 %v2681_v18, %v2645_v38  ;;  %2977 = vrot.lane.b32.xlu1 %v2910_v7, %s3463_s13  ;;  %v949_v5 = vmul.f32 %v3649_v47, %v887_v17  ;;  %v952_v34 = vmul.f32 %v3412_v2, %v3649_v47  ;;  %v1718_v37 = vsel %vm4118_vm11, %v4088_v3, 0.0 }
 0x117   : > { %v4189_v58 = vsel %vm1581_vm3, %v2381_v13, %v2382_v49  ;;  %v2285_v57 = vadd.f32 %v2253_v25, %v2217_v61  ;;  %v4201_v16 = vsel %vm1678_vm5, %v2478_v6, %v2479_v53  ;;  %v1754_v48 = vmul.f32 %v4081_v33, %v3604_v30  ;;  %v4213_v6 = vld [vmem:[#allocation2 + $0x60] sm:$0xff] }
 0x118   : > { %v2745_v27 = vadd.f32 %v2713_v4, %v2316_v40  ;;  %v2446_v18 = vsel %vm4064_vm10, %v4189_v58, 0.0  ;;  %v2682_v17 = vmul.f32 %v3909_v8, %v4201_v16  ;;  %v988_v1 = vadd.f32 %v3674_v59, %v949_v5 }
 0x119   : > { %v2578_v13 = vmul.f32 %v3655_v51, %v2446_v18  ;;  %v991_v20 = vadd.f32 %v3674_v59, %v952_v34  ;;  %v2317_v40 = vadd.f32 %v2285_v57, %v1889_v10  ;;  %v1790_v38 = vmul.f32 %v3923_v31, %v3612_v32 }
 0x11a   : > { %v2784_v3 = vadd.f32 %v3938_v11, %v2745_v27  ;;  %1026 = vst.msk [vmem:[#allocation2 + $0xd0] sm:$0xff] %vm720_vm2, %v988_v1  ;;  %v1858_v23 = vmul.f32 %v3653_v50, %v1718_v37  ;;  %v2114_v2 = vsel %vm4118_vm11, %v4153_v55, 0.0  ;;  %v2150_v7 = vmul.f32 %v4147_v24, %v3662_v54  ;;  %v3446_v27 = vld [vmem:[%s5749_s3] ss:$0 sm:$0xff] }
 0x11b   : > { %v2646_v56 = vadd.f32 %v2614_v12, %v2578_v13  ;;  %1029 = vst.msk [vmem:[#allocation2 + $0xe8] sm:$0xff] %vm720_vm2, %v991_v20  ;;  %v5826_v33 = vunpack.c.h.bf16 %v3680_v62  ;;  %v1822_v31 = vadd.f32 %v1790_v38, %v1754_v48  ;;  %v2186_v25 = vmul.f32 %v4000_v43, %v3639_v44 }
 0x11c   : > { %v2254_v4 = vmul.f32 %v3676_v60, %v2114_v2  ;;  %v2383_v12 = vrot.slane %v4169_v0, 7  ;;  %v2480_v5 = vrot.slane %v4213_v6, 1  ;;  %v2615_v34 = vmul.f32 %v3641_v45, %v4169_v0  ;;  %v4265_v2 = vld [vmem:[#allocation2 + $0x68] sm:$0xff] }
 0x11d   : > { %v2880_v10 = vadd.f32 %v5826_v33, %v2784_v3  ;;  %v2714_v61 = vadd.f32 %v2682_v17, %v2646_v56  ;;  %v5827_v37 = vand.u32 15, %v3698_v9  ;;  %v1890_v57 = vadd.f32 %v1858_v23, %v1822_v31  ;;  %v890_v3 = vpop.f32.mrf.mxu1 }
 0x11e   : > { %v2218_v18 = vadd.f32 %v2186_v25, %v2150_v7  ;;  %v1622_v13 = vsel %vm4173_vm12, %v4022_v46, 0.0  ;;  %v4243_v1 = vsel %vm1581_vm3, %v2382_v49, %v2383_v12  ;;  %v4247_v20 = vsel %vm1678_vm5, %v2479_v53, %v2480_v5 }
 0x11f   : > { %vm4234_vm13 = vcmp.lt.s32.totalorder %v5827_v37, 15  ;;  %v2912_v62 = vmax.f32 %v2880_v10, 0.0  ;;  %v2746_v17 = vadd.f32 %v2714_v61, %v2317_v40  ;;  %v1755_v9 = vmul.f32 %v3604_v30, %v1622_v13  ;;  %v3415_v37 = vpop.f32.mrf.mxu1 }
 0x120   : > { %v2286_v48 = vadd.f32 %v2254_v4, %v2218_v18  ;;  %v2543_v38 = vsel %vm4118_vm11, %v4247_v20, 0.0  ;;  %v2579_v46 = vmul.f32 %v3655_v51, %v4243_v1  ;;  %v1791_v49 = vmul.f32 %v3988_v21, %v3612_v32 }
 0x121   : > { %2981 = vrot.lane.b32.xlu1 %v2912_v62, %s3463_s13  ;;  %v2785_v40 = vadd.f32 %v3938_v11, %v2746_v17  ;;  %v2683_v53 = vmul.f32 %v3909_v8, %v2543_v38  ;;  %v1859_v56 = vmul.f32 %v4038_v35, %v3653_v50  ;;  %v2019_v23 = vsel %vm4173_vm12, %v4189_v58, 0.0 }
 0x122   : > { %v2318_v63 = vadd.f32 %v2286_v48, %v1890_v57  ;;  %v2647_v7 = vadd.f32 %v2615_v34, %v2579_v46  ;;  %v1823_v33 = vadd.f32 %v1791_v49, %v1755_v9  ;;  %v2151_v10 = vmul.f32 %v3662_v54, %v2019_v23 }
 0x123   : > { %v5830_v21 = vand.u32 15, %v3711_v19  ;;  %v5833_v25 = vunpack.c.l.bf16 %v3705_v14  ;;  %v2187_v4 = vmul.f32 %v4114_v15, %v3639_v44  ;;  %v2255_v61 = vmul.f32 %v4201_v16, %v3676_v60 }
 0x124   : > { %v2384_v34 = vrot.slane %v4213_v6, 7  ;;  %v2715_v62 = vadd.f32 %v2683_v53, %v2647_v7  ;;  %v1891_v57 = vadd.f32 %v1859_v56, %v1823_v33  ;;  %v2481_v19 = vrot.slane %v4265_v2, 1 }
 0x125   : > { %vm4270_vm14 = vcmp.gt.s32.totalorder %v5830_v21, 0  ;;  %v2881_v35 = vadd.f32 %v5833_v25, %v2785_v40  ;;  %v2616_v18 = vmul.f32 %v3641_v45, %v4213_v6  ;;  %v2219_v17 = vadd.f32 %v2187_v4, %v2151_v10  ;;  %v4313_v25 = vld [vmem:[#allocation2 + $0x70] sm:$0xff] }
 0x126   : > { %v4286_v9 = vsel %vm1581_vm3, %v2383_v12, %v2384_v34  ;;  %v950_v48 = vmul.f32 %v3649_v47, %v890_v3  ;;  %v2747_v38 = vadd.f32 %v2715_v62, %v2318_v63  ;;  %v4294_v49 = vsel %vm1678_vm5, %v2480_v5, %v2481_v19 }
 0x127   : > { %v2913_v13 = vmax.f32 %v2881_v35, 0.0  ;;  %v2448_v46 = vsel %vm4173_vm12, %v4286_v9, 0.0  ;;  %v955_v40 = vmul.f32 %v3415_v37, %v3649_v47  ;;  %v2287_v53 = vadd.f32 %v2255_v61, %v2219_v17 }
 0x128   : > { %v2580_v56 = vmul.f32 %v3655_v51, %v2448_v46  ;;  %v2684_v12 = vmul.f32 %v3909_v8, %v4294_v49  ;;  %v989_v3 = vadd.f32 %v3674_v59, %v950_v48  ;;  %v2786_v23 = vadd.f32 %v3938_v11, %v2747_v38 }
 0x129   : > { %2983 = vrot.lane.b32.xlu0 %v2913_v13, %s3463_s13  ;;  %v994_v39 = vadd.f32 %v3674_v59, %v955_v40  ;;  %v1720_v5 = vsel %vm4234_vm13, %v4153_v55, 0.0  ;;  %v1756_v63 = vmul.f32 %v4147_v24, %v3604_v30  ;;  %v2319_v7 = vadd.f32 %v2287_v53, %v1891_v57 }
 0x12a   : > { %v2648_v33 = vadd.f32 %v2616_v18, %v2580_v56  ;;  %1027 = vst.msk [vmem:[#allocation2 + $0xd8] sm:$0xff] %vm720_vm2, %v989_v3  ;;  %v1792_v10 = vmul.f32 %v4000_v43, %v3612_v32  ;;  %v1860_v21 = vmul.f32 %v3653_v50, %v1720_v5  ;;  %v5834_v35 = vunpack.c.h.bf16 %v3705_v14 }
 0x12b   : > { %1032 = vst.msk [vmem:[#allocation2 + $0x100] sm:$0xff] %vm720_vm2, %v994_v39  ;;  %v2116_v24 = vsel %vm4234_vm13, %v4247_v20, 0.0  ;;  %v2152_v55 = vmul.f32 %v4243_v1, %v3662_v54  ;;  %v2188_v61 = vmul.f32 %v4169_v0, %v3639_v44  ;;  %v2385_v57 = vrot.slane %v4265_v2, 7  ;;  %v903_v39 = vpop.f32.mrf.mxu1 }
 0x12c   : > { %v2882_v4 = vadd.f32 %v5834_v35, %v2786_v23  ;;  %v2716_v43 = vadd.f32 %v2684_v12, %v2648_v33  ;;  %v1824_v37 = vadd.f32 %v1792_v10, %v1756_v63  ;;  %v2256_v62 = vmul.f32 %v3676_v60, %v2116_v24 }
 0x12d   : > { %v5835_v14 = vand.u32 15, %v3721_v29  ;;  %v2220_v17 = vadd.f32 %v2188_v61, %v2152_v55  ;;  %v2482_v48 = vrot.slane %v4313_v25, 1  ;;  %v2617_v38 = vmul.f32 %v3641_v45, %v4265_v2 }
 0x12e   : > { %v2914_v13 = vmax.f32 %v2882_v4, 0.0  ;;  %v2748_v46 = vadd.f32 %v2716_v43, %v2319_v7  ;;  %v1892_v40 = vadd.f32 %v1860_v21, %v1824_v37  ;;  %v4338_v53 = vsel %vm1581_vm3, %v2384_v34, %v2385_v57 }
 0x12f   : > { %vm4329_vm15 = vcmp.lt.s32.totalorder %v5835_v14, 15  ;;  %v1624_v29 = vsel %vm4270_vm14, %v4189_v58, 0.0  ;;  %v2288_v56 = vadd.f32 %v2256_v62, %v2220_v17  ;;  %v4346_v12 = vsel %vm1678_vm5, %v2481_v19, %v2482_v48  ;;  %v4359_v19 = vld [vmem:[#allocation2 + $0x78] sm:$0xff]  ;;  %v3416_v62 = vpop.f32.mrf.mxu1 }
 0x130   : > { %2985 = vrot.lane.b32.xlu1 %v2914_v13, %s3463_s13  ;;  %v2581_v3 = vmul.f32 %v3655_v51, %v4338_v53  ;;  %v1757_v23 = vmul.f32 %v3604_v30, %v1624_v29  ;;  %v2787_v34 = vadd.f32 %v3938_v11, %v2748_v46  ;;  %v2545_v5 = vsel %vm4234_vm13, %v4346_v12, 0.0 }
 0x131   : > { %v1793_v58 = vmul.f32 %v4114_v15, %v3612_v32  ;;  %v1861_v63 = vmul.f32 %v4201_v16, %v3653_v50  ;;  %v2320_v7 = vadd.f32 %v2288_v56, %v1892_v40  ;;  %v2685_v10 = vmul.f32 %v3909_v8, %v2545_v5 }
 0x132   : > { %v2649_v33 = vadd.f32 %v2617_v38, %v2581_v3  ;;  %v2021_v21 = vsel %vm4270_vm14, %v4286_v9, 0.0  ;;  %v5838_v35 = vand.u32 15, %v3727_v36  ;;  %v5841_v15 = vunpack.c.l.bf16 %v3718_v28 }
 0x133   : > { %v1825_v16 = vadd.f32 %v1793_v58, %v1757_v23  ;;  %v2153_v24 = vmul.f32 %v3662_v54, %v2021_v21  ;;  %v2189_v55 = vmul.f32 %v4213_v6, %v3639_v44  ;;  %v2257_v43 = vmul.f32 %v4294_v49, %v3676_v60 }
 0x134   : > { %vm4367_vm0 = vcmp.gt.s32.totalorder %v5838_v35, 0  ;;  %v2883_v4 = vadd.f32 %v5841_v15, %v2787_v34  ;;  %v2717_v61 = vadd.f32 %v2685_v10, %v2649_v33  ;;  %v2386_v37 = vrot.slane %v4313_v25, 7 }
 0x135   : > { %v2483_v36 = vrot.slane %v4359_v19, 1  ;;  %v1893_v13 = vadd.f32 %v1861_v63, %v1825_v16  ;;  %v2221_v17 = vadd.f32 %v2189_v55, %v2153_v24  ;;  %v2618_v38 = vmul.f32 %v3641_v45, %v4313_v25 }
 0x136   : > { %v2915_v14 = vmax.f32 %v2883_v4, 0.0  ;;  %v2749_v46 = vadd.f32 %v2717_v61, %v2320_v7  ;;  %v4384_v40 = vsel %vm1581_vm3, %v2385_v57, %v2386_v37  ;;  %v953_v56 = vmul.f32 %v3649_v47, %v903_v39 }
 0x137   : > { %v4388_v29 = vsel %vm1678_vm5, %v2482_v48, %v2483_v36  ;;  %v2289_v3 = vadd.f32 %v2257_v43, %v2221_v17  ;;  %v2450_v23 = vsel %vm4270_vm14, %v4384_v40, 0.0  ;;  %v956_v5 = vmul.f32 %v3416_v62, %v3649_v47  ;;  %v4409_v47 = vld [vmem:[#allocation2 + $0x80] sm:$0xff] }
 0x138   : > { %2987 = vrot.lane.b32.xlu0 %v2915_v14, %s3463_s13  ;;  %v2686_v34 = vmul.f32 %v3909_v8, %v4388_v29  ;;  %v2788_v57 = vadd.f32 %v3938_v11, %v2749_v46  ;;  %v2582_v58 = vmul.f32 %v3655_v51, %v2450_v23  ;;  %v992_v48 = vadd.f32 %v3674_v59, %v953_v56 }
 0x139   : > { %v1722_v39 = vsel %vm4329_vm15, %v4247_v20, 0.0  ;;  %v2321_v63 = vadd.f32 %v2289_v3, %v1893_v13  ;;  %v995_v7 = vadd.f32 %v3674_v59, %v956_v5  ;;  %v1758_v31 = vmul.f32 %v4243_v1, %v3604_v30  ;;  %v5856_v1 = vld [vmem:[#allocation8_spill] sm:$0xff] }
 0x13a   : > { %v1794_v33 = vmul.f32 %v4169_v0, %v3612_v32  ;;  %v5842_v10 = vunpack.c.h.bf16 %v3718_v28  ;;  %v2650_v35 = vadd.f32 %v2618_v38, %v2582_v58  ;;  %1030 = vst.msk [vmem:[#allocation2 + $0xf0] sm:$0xff] %vm720_vm2, %v992_v48  ;;  %v1862_v15 = vmul.f32 %v3653_v50, %v1722_v39  ;;  %v4461_v58 = vld [vmem:[#allocation2 + $0x88] sm:$0xff]  ;;  %v4601_v48 = vld [vmem:[#allocation2 + $0xa0] sm:$0xff] }
 0x13b   : > { %v2118_v59 = vsel %vm4329_vm15, %v4346_v12, 0.0  ;;  %v5843_v20 = vand.u32 15, %v3740_v41  ;;  %1033 = vst.msk [vmem:[#allocation2 + $0x108] sm:$0xff] %vm720_vm2, %v995_v7  ;;  %v2154_v28 = vmul.f32 %v4338_v53, %v3662_v54  ;;  %v2190_v4 = vmul.f32 %v4265_v2, %v3639_v44 }
 0x13c   : > { %v2884_v21 = vadd.f32 %v5842_v10, %v2788_v57  ;;  %v1826_v0 = vadd.f32 %v1794_v33, %v1758_v31  ;;  %v2258_v16 = vmul.f32 %v3676_v60, %v2118_v59  ;;  %v2718_v55 = vadd.f32 %v2686_v34, %v2650_v35  ;;  %v906_v31 = vpop.f32.mrf.mxu1  ;;  %v5849_v33 = vld [vmem:[#allocation5_spill] sm:$0xff] }
 0x13d   : > { %vm4420_vm1 = vcmp.lt.s32.totalorder %v5843_v20, 15  ;;  %v2387_v61 = vrot.slane %v4359_v19, 7  ;;  %v2484_v41 = vrot.slane %v4409_v47, 1  ;;  %v2222_v62 = vadd.f32 %v2190_v4, %v2154_v28 }
 0x13e   : > { %v2916_v24 = vmax.f32 %v2884_v21, 0.0  ;;  %v1894_v43 = vadd.f32 %v1862_v15, %v1826_v0  ;;  %v2619_v14 = vmul.f32 %v3641_v45, %v4359_v19  ;;  %v1626_v13 = vsel %vm4367_vm0, %v4286_v9, 0.0 }
 0x13f   : > { %v2750_v17 = vadd.f32 %v2718_v55, %v2321_v63  ;;  %v4440_v38 = vsel %vm1581_vm3, %v2386_v37, %v2387_v61  ;;  %v4444_v46 = vsel %vm1678_vm5, %v2483_v36, %v2484_v41  ;;  %v1759_v56 = vmul.f32 %v3604_v30, %v1626_v13 }
 0x140   : > { %2989 = vrot.lane.b32.xlu1 %v2916_v24, %s3463_s13  ;;  %v2290_v3 = vadd.f32 %v2258_v16, %v2222_v62  ;;  %v2547_v23 = vsel %vm4329_vm15, %v4444_v46, 0.0  ;;  %v2583_v9 = vmul.f32 %v3655_v51, %v4440_v38  ;;  %v1795_v34 = vmul.f32 %v4213_v6, %v3612_v32  ;;  %v3445_v24 = vld [vmem:[%s5748_s2] ss:$0 sm:$0xff] }
 0x141   : > { %v2789_v37 = vadd.f32 %v3938_v11, %v2750_v17  ;;  %v2687_v5 = vmul.f32 %v3909_v8, %v2547_v23  ;;  %v1863_v36 = vmul.f32 %v4294_v49, %v3653_v50  ;;  %v2023_v57 = vsel %vm4367_vm0, %v4384_v40, 0.0 }
 0x142   : > { %v5846_v18 = vand.u32 15, %v3743_v42  ;;  %v2322_v6 = vadd.f32 %v2290_v3, %v1894_v43  ;;  %v2651_v39 = vadd.f32 %v2619_v14, %v2583_v9  ;;  %v1827_v63 = vadd.f32 %v1795_v34, %v1759_v56  ;;  %v4510_v34 = vld [vmem:[#allocation2 + $0x90] sm:$0xff] }
 0x143   : > { %v2155_v7 = vmul.f32 %v3662_v54, %v2023_v57  ;;  %v5850_v49 = vunpack.c.l.bf16 %v5849_v33  ;;  %v2191_v21 = vmul.f32 %v4313_v25, %v3639_v44  ;;  %v2259_v35 = vmul.f32 %v4388_v29, %v3676_v60 }
 0x144   : > { %vm4465_vm4 = vcmp.gt.s32.totalorder %v5846_v18, 0  ;;  %v2388_v42 = vrot.slane %v4409_v47, 7  ;;  %v2719_v15 = vadd.f32 %v2687_v5, %v2651_v39  ;;  %v1895_v59 = vadd.f32 %v1863_v36, %v1827_v63 }
 0x145   : > { %v2885_v10 = vadd.f32 %v5850_v49, %v2789_v37  ;;  %v2485_v20 = vrot.slane %v4461_v58, 1  ;;  %v2620_v0 = vmul.f32 %v3641_v45, %v4409_v47  ;;  %v2223_v4 = vadd.f32 %v2191_v21, %v2155_v7  ;;  %v5851_v37 = vld [vmem:[#allocation6_spill] sm:$0xff] }
 0x146   : > { %v4482_v16 = vsel %vm1581_vm3, %v2387_v61, %v2388_v42  ;;  %v954_v55 = vmul.f32 %v3445_v24, %v906_v31  ;;  %v2751_v43 = vadd.f32 %v2719_v15, %v2322_v6  ;;  %v1724_v13 = vsel %vm4420_vm1, %v4346_v12, 0.0 }
 0x147   : > { %v2917_v28 = vmax.f32 %v2885_v10, 0.0  ;;  %v2452_v62 = vsel %vm4367_vm0, %v4482_v16, 0.0  ;;  %v4492_v14 = vsel %vm1678_vm5, %v2484_v41, %v2485_v20  ;;  %v2291_v61 = vadd.f32 %v2259_v35, %v2223_v4 }
 0x148   : > { %v2584_v17 = vmul.f32 %v3655_v51, %v2452_v62  ;;  %v2688_v56 = vmul.f32 %v3909_v8, %v4492_v14  ;;  %v993_v3 = vadd.f32 %v3446_v27, %v954_v55  ;;  %v2790_v41 = vadd.f32 %v3938_v11, %v2751_v43 }
 0x149   : > { %2991 = vrot.lane.b32.xlu0 %v2917_v28, %s3463_s13  ;;  %v1760_v23 = vmul.f32 %v4338_v53, %v3604_v30  ;;  %v1796_v12 = vmul.f32 %v4265_v2, %v3612_v32  ;;  %v1864_v9 = vmul.f32 %v3653_v50, %v1724_v13  ;;  %v5852_v5 = vand.u32 15, %v5851_v37 }
 0x14a   : > { %v2323_v57 = vadd.f32 %v2291_v61, %v1895_v59  ;;  %v2652_v18 = vadd.f32 %v2620_v0, %v2584_v17  ;;  %1031 = vst.msk [vmem:[#allocation2 + $0xf8] sm:$0xff] %vm720_vm2, %v993_v3  ;;  %v2120_v53 = vsel %vm4420_vm1, %v4444_v46, 0.0  ;;  %v2156_v2 = vmul.f32 %v4440_v38, %v3662_v54 }
 0x14b   : > { %vm4514_vm6 = vcmp.lt.s32.totalorder %v5852_v5, 15  ;;  %v5855_v6 = vunpack.c.h.bf16 %v5849_v33  ;;  %v1828_v63 = vadd.f32 %v1796_v12, %v1760_v23  ;;  %v2192_v7 = vmul.f32 %v4359_v19, %v3639_v44 }
 0x14c   : > { %v2260_v31 = vmul.f32 %v3676_v60, %v2120_v53  ;;  %v2720_v49 = vadd.f32 %v2688_v56, %v2652_v18  ;;  %v2389_v10 = vrot.slane %v4461_v58, 7  ;;  %v2486_v21 = vrot.slane %v4510_v34, 1  ;;  %v4560_v56 = vld [vmem:[#allocation2 + $0x98] sm:$0xff] }
 0x14d   : > { %v2886_v39 = vadd.f32 %v5855_v6, %v2790_v41  ;;  %v2621_v35 = vmul.f32 %v3641_v45, %v4461_v58  ;;  %v1896_v59 = vadd.f32 %v1864_v9, %v1828_v63  ;;  %v2224_v0 = vadd.f32 %v2192_v7, %v2156_v2  ;;  %v5860_v9 = vld [vmem:[#allocation7_spill] sm:$0xff] }
 0x14e   : > { %v1628_v33 = vsel %vm4465_vm4, %v4384_v40, 0.0  ;;  %v2752_v28 = vadd.f32 %v2720_v49, %v2323_v57  ;;  %v4538_v4 = vsel %vm1581_vm3, %v2388_v42, %v2389_v10  ;;  %v4542_v24 = vsel %vm1678_vm5, %v2485_v20, %v2486_v21 }
 0x14f   : > { %v2918_v15 = vmax.f32 %v2886_v39, 0.0  ;;  %v1761_v55 = vmul.f32 %v3604_v30, %v1628_v33  ;;  %v2292_v43 = vadd.f32 %v2260_v31, %v2224_v0  ;;  %v2549_v62 = vsel %vm4420_vm1, %v4542_v24, 0.0 }
 0x150   : > { %v2585_v40 = vmul.f32 %v3655_v51, %v4538_v4  ;;  %v1797_v42 = vmul.f32 %v4313_v25, %v3612_v32  ;;  %v2791_v13 = vadd.f32 %v3938_v11, %v2752_v28  ;;  %v2689_v20 = vmul.f32 %v3909_v8, %v2549_v62 }
 0x151   : > { %2993 = vrot.lane.b32.xlu1 %v2918_v15, %s3463_s13  ;;  %v1865_v61 = vmul.f32 %v4388_v29, %v3653_v50  ;;  %v2025_v17 = vsel %vm4465_vm4, %v4482_v16, 0.0  ;;  %v5857_v27 = vand.u32 15, %v5856_v1  ;;  %v2324_v25 = vadd.f32 %v2292_v43, %v1896_v59 }
 0x152   : > { %v2653_v41 = vadd.f32 %v2621_v35, %v2585_v40  ;;  %v1829_v23 = vadd.f32 %v1797_v42, %v1761_v55  ;;  %v2157_v12 = vmul.f32 %v3662_v54, %v2025_v17  ;;  %v5861_v37 = vunpack.c.l.bf16 %v5860_v9 }
 0x153   : > { %vm4564_vm7 = vcmp.gt.s32.totalorder %v5857_v27, 0  ;;  %v2193_v5 = vmul.f32 %v4409_v47, %v3639_v44  ;;  %v2261_v57 = vmul.f32 %v4492_v14, %v3676_v60  ;;  %v2390_v18 = vrot.slane %v4510_v34, 7 }
 0x154   : > { %v2887_v29 = vadd.f32 %v5861_v37, %v2791_v13  ;;  %v2721_v53 = vadd.f32 %v2689_v20, %v2653_v41  ;;  %v1897_v2 = vadd.f32 %v1865_v61, %v1829_v23  ;;  %v2487_v6 = vrot.slane %v4560_v56, 1  ;;  %v4749_v61 = vld [vmem:[%s5753_s7] ss:$0 sm:$0xff] }
 0x155   : > { %v2622_v39 = vmul.f32 %v3641_v45, %v4510_v34  ;;  %v2225_v7 = vadd.f32 %v2193_v5, %v2157_v12  ;;  %v4581_v31 = vsel %vm1581_vm3, %v2389_v10, %v2390_v18  ;;  %v1726_v49 = vsel %vm4514_vm6, %v4444_v46, 0.0 }
 0x156   : > { %v2919_v63 = vmax.f32 %v2887_v29, 0.0  ;;  %v2753_v35 = vadd.f32 %v2721_v53, %v2324_v25  ;;  %v2454_v15 = vsel %vm4465_vm4, %v4581_v31, 0.0  ;;  %v4591_v59 = vsel %vm1678_vm5, %v2486_v21, %v2487_v6 }
 0x157   : > { %v1762_v0 = vmul.f32 %v4440_v38, %v3604_v30  ;;  %v2293_v10 = vadd.f32 %v2261_v57, %v2225_v7  ;;  %v2586_v33 = vmul.f32 %v3655_v51, %v2454_v15  ;;  %v2690_v46 = vmul.f32 %v3909_v8, %v4591_v59 }
 0x158   : > { %2995 = vrot.lane.b32.xlu0 %v2919_v63, %s3463_s13  ;;  %v1798_v28 = vmul.f32 %v4359_v19, %v3612_v32  ;;  %v2792_v55 = vadd.f32 %v3938_v11, %v2753_v35  ;;  %v1866_v21 = vmul.f32 %v3653_v50, %v1726_v49  ;;  %v2122_v38 = vsel %vm4514_vm6, %v4542_v24, 0.0  ;;  %v5862_v19 = vld [vmem:[#allocation10_spill] sm:$0xff]  ;;  %v4648_v35 = vld [vmem:[#allocation2 + $0xa8] sm:$0xff] }
 0x159   : > { %v2158_v43 = vmul.f32 %v4538_v4, %v3662_v54  ;;  %v2325_v62 = vadd.f32 %v2293_v10, %v1897_v2  ;;  %v2654_v40 = vadd.f32 %v2622_v39, %v2586_v33  ;;  %v2194_v13 = vmul.f32 %v4461_v58, %v3639_v44  ;;  %v4655_v33 = vld [vmem:[%s3626_s23 + $0x40] sm:$0xff]  }
 0x15a   : > { %v1830_v42 = vadd.f32 %v1798_v28, %v1762_v0  ;;  %v5863_v20 = vand.u32 15, %v5862_v19  ;;  %v5866_v17 = vunpack.c.h.bf16 %v5860_v9  ;;  %v2262_v27 = vmul.f32 %v3676_v60, %v2122_v38  ;;  %v5871_v38 = vld [vmem:[#allocation9_spill] sm:$0xff] }
 0x15b   : > { %v2391_v25 = vrot.slane %v4560_v56, 7  ;;  %v2488_v41 = vrot.slane %v4601_v48, 1  ;;  %v2722_v23 = vadd.f32 %v2690_v46, %v2654_v40  ;;  %v2226_v37 = vadd.f32 %v2194_v13, %v2158_v43 }
 0x15c   : > { %vm4614_vm8 = vcmp.lt.s32.totalorder %v5863_v20, 15  ;;  %v2888_v1 = vadd.f32 %v5866_v17, %v2792_v55  ;;  %v1898_v12 = vadd.f32 %v1866_v21, %v1830_v42  ;;  %v2623_v29 = vmul.f32 %v3641_v45, %v4560_v56 }
 0x15d   : > { %v4627_v57 = vsel %vm1581_vm3, %v2390_v18, %v2391_v25  ;;  %v4631_v9 = vsel %vm1678_vm5, %v2487_v6, %v2488_v41  ;;  %v1630_v53 = vsel %vm4564_vm7, %v4482_v16, 0.0  ;;  %v2754_v2 = vadd.f32 %v2722_v23, %v2325_v62 }
 0x15e   : > { %v2920_v5 = vmax.f32 %v2888_v1, 0.0  ;;  %v2294_v39 = vadd.f32 %v2262_v27, %v2226_v37  ;;  %v2551_v63 = vsel %vm4514_vm6, %v4631_v9, 0.0  ;;  %v2587_v7 = vmul.f32 %v3655_v51, %v4627_v57 }
 0x15f   : > { %v2691_v18 = vmul.f32 %v3909_v8, %v2551_v63  ;;  %v1763_v6 = vmul.f32 %v3604_v30, %v1630_v53  ;;  %v1799_v49 = vmul.f32 %v4409_v47, %v3612_v32  ;;  %v1867_v16 = vmul.f32 %v4492_v14, %v3653_v50  ;;  %v5867_v8 = vld [vmem:[#allocation11_spill] sm:$0xff]  ;;  %v4689_v53 = vld [vmem:[%s5752_s6 + $0x8] ss:$0 sm:$0xff] }
 0x160   : > { %2997 = vrot.lane.b32.xlu1 %v2920_v5, %s3463_s13  ;;  %v2793_v36 = vadd.f32 %v3938_v11, %v2754_v2  ;;  %v2326_v15 = vadd.f32 %v2294_v39, %v1898_v12  ;;  %v2655_v0 = vadd.f32 %v2623_v29, %v2587_v7  ;;  %v2027_v10 = vsel %vm4564_vm7, %v4581_v31, 0.0  ;;  %v4703_v7 = vld [vmem:[#allocation2 + $0xb0] sm:$0xff] }
 0x161   : > { %v5868_v46 = vand.u32 15, %v5867_v8  ;;  %v1831_v47 = vadd.f32 %v1799_v49, %v1763_v6  ;;  %v2159_v14 = vmul.f32 %v3662_v54, %v2027_v10  ;;  %v2195_v55 = vmul.f32 %v4510_v34, %v3639_v44 }
 0x162   : > { %v2263_v21 = vmul.f32 %v4591_v59, %v3676_v60  ;;  %v5872_v43 = vunpack.c.l.bf16 %v5871_v38  ;;  %v2723_v40 = vadd.f32 %v2691_v18, %v2655_v0  ;;  %v2392_v42 = vrot.slane %v4601_v48, 7 }
 0x163   : > { %vm4659_vm9 = vcmp.gt.s32.totalorder %v5868_v46, 0  ;;  %v2489_v13 = vrot.slane %v4648_v35, 1  ;;  %v1899_v19 = vadd.f32 %v1867_v16, %v1831_v47  ;;  %v2227_v20 = vadd.f32 %v2195_v55, %v2159_v14 }
 0x164   : > { %v2889_v62 = vadd.f32 %v5872_v43, %v2793_v36  ;;  %v2624_v17 = vmul.f32 %v3641_v45, %v4601_v48  ;;  %v3270_v1 = vunpack.c.l.bf16 %v4655_v33  ;;  %v2755_v23 = vadd.f32 %v2723_v40, %v2326_v15 }
 0x165   : > { %v4677_v12 = vsel %vm1581_vm3, %v2391_v25, %v2392_v42  ;;  %v4681_v37 = vsel %vm1678_vm5, %v2488_v41, %v2489_v13  ;;  %v2295_v29 = vadd.f32 %v2263_v21, %v2227_v20  ;;  %v1728_v25 = vsel %vm4614_vm8, %v4542_v24, 0.0 }
 0x166   : > { %v2921_v27 = vmax.f32 %v2889_v62, 0.0  ;;  %v2456_v5 = vsel %vm4564_vm7, %v4677_v12, 0.0  ;;  %v2692_v2 = vmul.f32 %v4689_v53, %v4681_v37  ;;  %v2794_v41 = vadd.f32 %v3938_v11, %v2755_v23 }
 0x167   : > { %v2588_v39 = vmul.f32 %v3655_v51, %v2456_v5  ;;  %v1764_v3 = vmul.f32 %v4538_v4, %v3604_v30  ;;  %v1800_v63 = vmul.f32 %v4461_v58, %v3612_v32  ;;  %v2327_v18 = vadd.f32 %v2295_v29, %v1899_v19 }
 0x168   : > { %2999 = vrot.lane.b32.xlu0 %v2921_v27, %s3463_s13  ;;  %v1868_v6 = vmul.f32 %v3653_v50, %v1728_v25  ;;  %v2124_v24 = vsel %vm4614_vm8, %v4631_v9, 0.0  ;;  %v2160_v11 = vmul.f32 %v4627_v57, %v3662_v54  ;;  %v5873_v49 = vunpack.c.h.bf16 %v5871_v38  ;;  %v4744_v27 = vld [vmem:[#allocation2 + $0xb8] sm:$0xff]  ;;  %v4756_v25 = vld [vmem:[%s3626_s23 + $0x48] sm:$0xff]  }
 0x169   : > { %v2656_v36 = vadd.f32 %v2624_v17, %v2588_v39  ;;  %v1832_v4 = vadd.f32 %v1800_v63, %v1764_v3  ;;  %v2196_v58 = vmul.f32 %v4560_v56, %v3639_v44  ;;  %v2264_v15 = vmul.f32 %v3676_v60, %v2124_v24 }
 0x16a   : > { %v2890_v16 = vadd.f32 %v5873_v49, %v2794_v41  ;;  %v2393_v0 = vrot.slane %v4648_v35, 7  ;;  %v2490_v10 = vrot.slane %v4703_v7, 1  ;;  %v2625_v8 = vmul.f32 %v3641_v45, %v4648_v35 }
 0x16b   : > { %v2724_v47 = vadd.f32 %v2692_v2, %v2656_v36  ;;  %v1900_v14 = vadd.f32 %v1868_v6, %v1832_v4  ;;  %v2228_v55 = vadd.f32 %v2196_v58, %v2160_v11  ;;  %v3271_v43 = vunpack.c.h.bf16 %v4655_v33 }
 0x16c   : > { %v2922_v46 = vmax.f32 %v2890_v16, 0.0  ;;  %v4722_v21 = vsel %vm1581_vm3, %v2392_v42, %v2393_v0  ;;  %v4726_v38 = vsel %vm1678_vm5, %v2489_v13, %v2490_v10  ;;  %v1632_v62 = vsel %vm4659_vm9, %v4581_v31, 0.0 }
 0x16d   : > { %v2756_v40 = vadd.f32 %v2724_v47, %v2327_v18  ;;  %v2296_v19 = vadd.f32 %v2264_v15, %v2228_v55  ;;  %v2553_v42 = vsel %vm4614_vm8, %v4726_v38, 0.0  ;;  %v2589_v20 = vmul.f32 %v3655_v51, %v4722_v21 }
 0x16e   : > { %3001 = vrot.lane.b32.xlu1 %v2922_v46, %s3463_s13  ;;  %v2693_v13 = vmul.f32 %v4689_v53, %v2553_v42  ;;  %v1765_v33 = vmul.f32 %v3604_v30, %v1632_v62  ;;  %v1801_v17 = vmul.f32 %v4510_v34, %v3612_v32  ;;  %v1869_v31 = vmul.f32 %v4591_v59, %v3653_v50  ;;  %v4791_v62 = vld [vmem:[#allocation2 + $0xc0] sm:$0xff] }
 0x16f   : > { %v2795_v23 = vadd.f32 %v4749_v61, %v2756_v40  ;;  %v2328_v29 = vadd.f32 %v2296_v19, %v1900_v14  ;;  %v2657_v5 = vadd.f32 %v2625_v8, %v2589_v20  ;;  %v2029_v2 = vsel %vm4659_vm9, %v4677_v12, 0.0  ;;  %v4782_v14 = vpop.f32.mrf.mxu0 }
 0x170   : > { %v1833_v34 = vadd.f32 %v1801_v17, %v1765_v33  ;;  %v2161_v59 = vmul.f32 %v3662_v54, %v2029_v2  ;;  %v2197_v41 = vmul.f32 %v4601_v48, %v3639_v44  ;;  %v2265_v39 = vmul.f32 %v4681_v37, %v3676_v60 }
 0x171   : > { %v2891_v3 = vadd.f32 %v3270_v1, %v2795_v23  ;;  %v2725_v63 = vadd.f32 %v2693_v13, %v2657_v5  ;;  %v2394_v18 = vrot.slane %v4703_v7, 7  ;;  %v2491_v6 = vrot.slane %v4744_v27, 1  ;;  %v4805_v5 = vpop.f32.mrf.mxu0 }
 0x172   : > { %v1901_v24 = vadd.f32 %v1869_v31, %v1833_v34  ;;  %v2229_v11 = vadd.f32 %v2197_v41, %v2161_v59  ;;  %v2626_v49 = vmul.f32 %v3641_v45, %v4703_v7  ;;  %v3274_v16 = vunpack.c.l.bf16 %v4756_v25 }
 0x173   : > { %v2923_v36 = vmax.f32 %v2891_v3, 0.0  ;;  %v2757_v4 = vadd.f32 %v2725_v63, %v2328_v29  ;;  %v4770_v58 = vsel %vm1581_vm3, %v2393_v0, %v2394_v18  ;;  %v4774_v1 = vsel %vm1678_vm5, %v2490_v10, %v2491_v6 }
 0x174   : > { %v2297_v15 = vadd.f32 %v2265_v39, %v2229_v11  ;;  %v2458_v8 = vsel %vm4659_vm9, %v4770_v58, 0.0  ;;  %v2694_v46 = vmul.f32 %v4689_v53, %v4774_v1  ;;  %v1056_v47 = vadd.s32 152, %v3590_v22 }
 0x175   : > { %3003 = vrot.lane.b32.xlu0 %v2923_v36, %s3463_s13  ;;  %v2796_v0 = vadd.f32 %v4749_v61, %v2757_v4  ;;  %v2590_v55 = vmul.f32 %v3655_v51, %v2458_v8  ;;  %v1766_v10 = vmul.f32 %v4627_v57, %v3604_v30  ;;  %v1802_v28 = vmul.f32 %v4560_v56, %v3612_v32  ;;  %v4834_v8 = vpop.f32.mrf.mxu0 }
 0x176   : > { %v2329_v40 = vadd.f32 %v2297_v15, %v1901_v24  ;;  %v1206_v19 = vand.u32 15, %v1056_v47  ;;  %v2162_v42 = vmul.f32 %v4722_v21, %v3662_v54  ;;  %v2198_v20 = vmul.f32 %v4648_v35, %v3639_v44  ;;  %v4832_v15 = vld [vmem:[#allocation2 + $0xc8] sm:$0xff] }
 0x177   : > { %v2892_v13 = vadd.f32 %v3271_v43, %v2796_v0  ;;  %v2658_v33 = vadd.f32 %v2626_v49, %v2590_v55  ;;  %v1834_v17 = vadd.f32 %v1802_v28, %v1766_v10  ;;  %v2395_v31 = vrot.slane %v4744_v27, 7 }
 0x178   : > { %vm4798_vm10 = vcmp.lt.s32.totalorder %v1206_v19, 15  ;;  %v2230_v56 = vadd.f32 %v2198_v20, %v2162_v42  ;;  %v2492_v23 = vrot.slane %v4791_v62, 1  ;;  %v2627_v29 = vmul.f32 %v3641_v45, %v4744_v27 }
 0x179   : > { %v2924_v2 = vmax.f32 %v2892_v13, 0.0  ;;  %v2726_v34 = vadd.f32 %v2694_v46, %v2658_v33  ;;  %v1730_v43 = vsel %vm4798_vm10, %v4631_v9, 0.0  ;;  %v2126_v59 = vsel %vm4798_vm10, %v4726_v38, 0.0 }
 0x17a   : > { %v1870_v41 = vmul.f32 %v3653_v50, %v1730_v43  ;;  %v2266_v39 = vmul.f32 %v3676_v60, %v2126_v59  ;;  %v4817_v3 = vsel %vm1581_vm3, %v2394_v18, %v2395_v31  ;;  %v4821_v63 = vsel %vm1678_vm5, %v2491_v6, %v2492_v23 }
 0x17b   : > { %3005 = vrot.lane.b32.xlu1 %v2924_v2, %s3463_s13  ;;  %v2758_v9 = vadd.f32 %v2726_v34, %v2329_v40  ;;  %v2555_v24 = vsel %vm4798_vm10, %v4821_v63, 0.0  ;;  %v2591_v11 = vmul.f32 %v3655_v51, %v4817_v3  ;;  %v3275_v49 = vunpack.c.h.bf16 %v4756_v25  ;;  %v4842_v25 = vld [vmem:[%s3626_s23 + $0x50] sm:$0xff]  }
 0x17c   : > { %v1902_v36 = vadd.f32 %v1870_v41, %v1834_v17  ;;  %v2298_v18 = vadd.f32 %v2266_v39, %v2230_v56  ;;  %v2695_v4 = vmul.f32 %v4689_v53, %v2555_v24  ;;  %v1057_v6 = vadd.s32 160, %v3590_v22  ;;  %v4858_v56 = vpop.f32.mrf.mxu0 }
 0x17d   : > { %v2797_v46 = vadd.f32 %v4749_v61, %v2758_v9  ;;  %v2659_v47 = vadd.f32 %v2627_v29, %v2591_v11  ;;  %v1803_v0 = vmul.f32 %v4601_v48, %v3612_v32  ;;  %v1871_v55 = vmul.f32 %v4681_v37, %v3653_v50 }
 0x17e   : > { %v2330_v10 = vadd.f32 %v2298_v18, %v1902_v36  ;;  %v1213_v28 = vand.u32 15, %v1057_v6  ;;  %v2199_v40 = vmul.f32 %v4703_v7, %v3639_v44  ;;  %v2267_v19 = vmul.f32 %v4774_v1, %v3676_v60 }
 0x17f   : > { %v2893_v42 = vadd.f32 %v3274_v16, %v2797_v46  ;;  %v2727_v20 = vadd.f32 %v2695_v4, %v2659_v47  ;;  %v2396_v13 = vrot.slane %v4791_v62, 7  ;;  %v2493_v33 = vrot.slane %v4832_v15, 1  ;;  %v4886_v4 = vpop.f32.mrf.mxu0 }
 0x180   : > { %vm4850_vm11 = vcmp.gt.s32.totalorder %v1213_v28, 0  ;;  %v2628_v37 = vmul.f32 %v3641_v45, %v4791_v62  ;;  %v3278_v17 = vunpack.c.l.bf16 %v4842_v25  ;;  %v1058_v57 = vadd.s32 168, %v3590_v22 }
 0x181   : > { %v2925_v29 = vmax.f32 %v2893_v42, 0.0  ;;  %v2759_v16 = vadd.f32 %v2727_v20, %v2330_v10  ;;  %v1634_v2 = vsel %vm4850_vm11, %v4677_v12, 0.0  ;;  %v2031_v34 = vsel %vm4850_vm11, %v4770_v58, 0.0  ;;  %v4899_v42 = vld [vmem:[#allocation2 + $0xd0] sm:$0xff] }
 0x182   : > { %v1767_v43 = vmul.f32 %v3604_v30, %v1634_v2  ;;  %v2163_v59 = vmul.f32 %v3662_v54, %v2031_v34  ;;  %v4870_v41 = vsel %vm1581_vm3, %v2395_v31, %v2396_v13  ;;  %v4874_v39 = vsel %vm1678_vm5, %v2492_v23, %v2493_v33 }
 0x183   : > { %3007 = vrot.lane.b32.xlu0 %v2925_v29, %s3463_s13  ;;  %v2798_v12 = vadd.f32 %v4749_v61, %v2759_v16  ;;  %v2460_v9 = vsel %vm4850_vm11, %v4870_v41, 0.0  ;;  %v2696_v24 = vmul.f32 %v4689_v53, %v4874_v39  ;;  %v1220_v11 = vand.u32 15, %v1058_v57 }
 0x184   : > { %v1835_v36 = vadd.f32 %v1803_v0, %v1767_v43  ;;  %v2231_v18 = vadd.f32 %v2199_v40, %v2163_v59  ;;  %v2592_v31 = vmul.f32 %v3655_v51, %v2460_v9  ;;  %v1768_v23 = vmul.f32 %v4722_v21, %v3604_v30 }
 0x185   : > { %v2894_v6 = vadd.f32 %v3275_v49, %v2798_v12  ;;  %vm4888_vm12 = vcmp.lt.s32.totalorder %v1220_v11, 15  ;;  %v1804_v47 = vmul.f32 %v4648_v35, %v3612_v32  ;;  %v2164_v10 = vmul.f32 %v4817_v3, %v3662_v54 }
 0x186   : > { %v1903_v0 = vadd.f32 %v1871_v55, %v1835_v36  ;;  %v2299_v28 = vadd.f32 %v2267_v19, %v2231_v18  ;;  %v2660_v40 = vadd.f32 %v2628_v37, %v2592_v31  ;;  %v1732_v21 = vsel %vm4888_vm12, %v4726_v38, 0.0  ;;  %v4908_v37 = vpop.f32.mrf.mxu0 }
 0x187   : > { %v2926_v49 = vmax.f32 %v2894_v6, 0.0  ;;  %v1836_v20 = vadd.f32 %v1804_v47, %v1768_v23  ;;  %v1872_v48 = vmul.f32 %v3653_v50, %v1732_v21  ;;  %v2128_v35 = vsel %vm4888_vm12, %v4821_v63, 0.0  ;;  %v4935_v47 = vld [vmem:[#allocation2 + $0xd8] sm:$0xff] }
 0x188   : > { %v2331_v57 = vadd.f32 %v2299_v28, %v1903_v0  ;;  %v2728_v29 = vadd.f32 %v2696_v24, %v2660_v40  ;;  %v2200_v55 = vmul.f32 %v4744_v27, %v3639_v44  ;;  %v2268_v19 = vmul.f32 %v3676_v60, %v2128_v35 }
 0x189   : > { %3009 = vrot.lane.b32.xlu1 %v2926_v49, %s3463_s13  ;;  %v1904_v38 = vadd.f32 %v1872_v48, %v1836_v20  ;;  %v2397_v16 = vrot.slane %v4832_v15, 7  ;;  %v2494_v2 = vrot.slane %v4899_v42, 1  ;;  %v2629_v34 = vmul.f32 %v3641_v45, %v4832_v15 }
 0x18a   : > { %v2760_v43 = vadd.f32 %v2728_v29, %v2331_v57  ;;  %v2232_v59 = vadd.f32 %v2200_v55, %v2164_v10  ;;  %v3279_v12 = vunpack.c.h.bf16 %v4842_v25  ;;  %v1059_v9 = vadd.s32 176, %v3590_v22  ;;  %v4940_v10 = vpop.f32.mrf.mxu0 }
 0x18b   : > { %v4919_v24 = vsel %vm1581_vm3, %v2396_v13, %v2397_v16  ;;  %v4923_v11 = vsel %vm1678_vm5, %v2493_v33, %v2494_v2  ;;  %v1805_v36 = vmul.f32 %v4703_v7, %v3612_v32  ;;  %v1873_v18 = vmul.f32 %v4774_v1, %v3653_v50  ;;  %v4938_v33 = vld [vmem:[%s3626_s23 + $0x58] sm:$0xff]  }
 0x18c   : > { %v2799_v31 = vadd.f32 %v4749_v61, %v2760_v43  ;;  %v2300_v23 = vadd.f32 %v2268_v19, %v2232_v59  ;;  %v2557_v6 = vsel %vm4888_vm12, %v4923_v11, 0.0  ;;  %v2593_v13 = vmul.f32 %v3655_v51, %v4919_v24  ;;  %v4964_v19 = vpop.f32.mrf.mxu0 }
 0x18d   : > { %v2697_v7 = vmul.f32 %v4689_v53, %v2557_v6  ;;  %v1227_v0 = vand.u32 15, %v1059_v9  ;;  %v2201_v1 = vmul.f32 %v4791_v62, %v3639_v44  ;;  %v2269_v28 = vmul.f32 %v4874_v39, %v3676_v60 }
 0x18e   : > { %v2895_v46 = vadd.f32 %v3278_v17, %v2799_v31  ;;  %v2332_v40 = vadd.f32 %v2300_v23, %v1904_v38  ;;  %v2661_v21 = vadd.f32 %v2629_v34, %v2593_v13  ;;  %v2398_v49 = vrot.slane %v4899_v42, 7 }
 0x18f   : > { %vm4950_vm13 = vcmp.gt.s32.totalorder %v1227_v0, 0  ;;  %v2495_v48 = vrot.slane %v4935_v47, 1  ;;  %v2630_v35 = vmul.f32 %v3641_v45, %v4899_v42  ;;  %v3282_v57 = vunpack.c.l.bf16 %v4938_v33 }
 0x190   : > { %v2927_v29 = vmax.f32 %v2895_v46, 0.0  ;;  %v2729_v55 = vadd.f32 %v2697_v7, %v2661_v21  ;;  %v1636_v25 = vsel %vm4950_vm13, %v4770_v58, 0.0  ;;  %v2033_v17 = vsel %vm4950_vm13, %v4870_v41, 0.0  ;;  %v4991_v21 = vpop.f32.mrf.mxu0 }
 0x191   : > { %v1769_v38 = vmul.f32 %v3604_v30, %v1636_v25  ;;  %v2165_v34 = vmul.f32 %v3662_v54, %v2033_v17  ;;  %v4970_v43 = vsel %vm1581_vm3, %v2397_v16, %v2398_v49  ;;  %v4974_v59 = vsel %vm1678_vm5, %v2494_v2, %v2495_v48  ;;  %5882 = vst [vmem:[#allocation5_spill] sm:$0xff] %v4991_v21  ;;  %v4999_v17 = vld [vmem:[#allocation2 + $0xe0] sm:$0xff] }
 0x192   : > { %3011 = vrot.lane.b32.xlu0 %v2927_v29, %s3463_s13  ;;  %v2761_v58 = vadd.f32 %v2729_v55, %v2332_v40  ;;  %v2462_v9 = vsel %vm4950_vm13, %v4970_v43, 0.0  ;;  %v2698_v31 = vmul.f32 %v4689_v53, %v4974_v59  ;;  %v1060_v23 = vadd.s32 184, %v3590_v22 }
 0x193   : > { %v1837_v6 = vadd.f32 %v1805_v36, %v1769_v38  ;;  %v2233_v13 = vadd.f32 %v2201_v1, %v2165_v34  ;;  %v2594_v16 = vmul.f32 %v3655_v51, %v2462_v9  ;;  %v1770_v2 = vmul.f32 %v4817_v3, %v3604_v30 }
 0x194   : > { %v2800_v7 = vadd.f32 %v4749_v61, %v2761_v58  ;;  %v1234_v0 = vand.u32 15, %v1060_v23  ;;  %v1806_v46 = vmul.f32 %v4744_v27, %v3612_v32  ;;  %v2166_v40 = vmul.f32 %v4919_v24, %v3662_v54  ;;  %v5010_v23 = vpop.f32.mrf.mxu0 }
 0x195   : > { %v1905_v20 = vadd.f32 %v1873_v18, %v1837_v6  ;;  %v2301_v29 = vadd.f32 %v2269_v28, %v2233_v13  ;;  %v2662_v36 = vadd.f32 %v2630_v35, %v2594_v16  ;;  %v2202_v1 = vmul.f32 %v4832_v15, %v3639_v44  ;;  %5885 = vst [vmem:[#allocation6_spill] sm:$0xff] %v5010_v23 }
 0x196   : > { %v2896_v55 = vadd.f32 %v3279_v12, %v2800_v7  ;;  %vm4995_vm14 = vcmp.lt.s32.totalorder %v1234_v0, 15  ;;  %v1838_v25 = vadd.f32 %v1806_v46, %v1770_v2  ;;  %v2399_v27 = vrot.slane %v4935_v47, 7 }
 0x197   : > { %v2333_v38 = vadd.f32 %v2301_v29, %v1905_v20  ;;  %v2730_v34 = vadd.f32 %v2698_v31, %v2662_v36  ;;  %v1734_v18 = vsel %vm4995_vm14, %v4821_v63, 0.0  ;;  %v2130_v28 = vsel %vm4995_vm14, %v4923_v11, 0.0  ;;  %v5031_v29 = vld [vmem:[#allocation2 + $0xe8] sm:$0xff] }
 0x198   : > { %v2928_v12 = vmax.f32 %v2896_v55, 0.0  ;;  %v1874_v35 = vmul.f32 %v3653_v50, %v1734_v18  ;;  %v2234_v58 = vadd.f32 %v2202_v1, %v2166_v40  ;;  %v2270_v9 = vmul.f32 %v3676_v60, %v2130_v28 }
 0x199   : > { %v2762_v6 = vadd.f32 %v2730_v34, %v2333_v38  ;;  %v5014_v31 = vsel %vm1581_vm3, %v2398_v49, %v2399_v27  ;;  %v2496_v13 = vrot.slane %v4999_v17, 1  ;;  %v2631_v63 = vmul.f32 %v3641_v45, %v4935_v47 }
 0x19a   : > { %3013 = vrot.lane.b32.xlu1 %v2928_v12, %s3463_s13  ;;  %v1906_v16 = vadd.f32 %v1874_v35, %v1838_v25  ;;  %v2302_v2 = vadd.f32 %v2270_v9, %v2234_v58  ;;  %v2595_v7 = vmul.f32 %v3655_v51, %v5014_v31  ;;  %v3283_v0 = vunpack.c.h.bf16 %v4938_v33  ;;  %v5039_v25 = vld [vmem:[%s3626_s23 + $0x60] sm:$0xff]  }
 0x19b   : > { %v2801_v46 = vadd.f32 %v4749_v61, %v2762_v6  ;;  %v5026_v49 = vsel %vm1678_vm5, %v2495_v48, %v2496_v13  ;;  %v1061_v40 = vadd.s32 192, %v3590_v22  ;;  %v1807_v20 = vmul.f32 %v4791_v62, %v3612_v32  ;;  %v5041_v48 = vpop.f32.mrf.mxu0 }
 0x19c   : > { %v2334_v36 = vadd.f32 %v2302_v2, %v1906_v16  ;;  %v2559_v1 = vsel %vm4995_vm14, %v5026_v49, 0.0  ;;  %v2663_v55 = vadd.f32 %v2631_v63, %v2595_v7  ;;  %v1875_v33 = vmul.f32 %v4874_v39, %v3653_v50  ;;  %5886 = vst [vmem:[#allocation8_spill] sm:$0xff] %v5041_v48 }
 0x19d   : > { %v2897_v38 = vadd.f32 %v3282_v57, %v2801_v46  ;;  %v2699_v34 = vmul.f32 %v4689_v53, %v2559_v1  ;;  %v1241_v18 = vand.u32 15, %v1061_v40  ;;  %v2203_v62 = vmul.f32 %v4899_v42, %v3639_v44  ;;  %v5063_v2 = vpop.f32.mrf.mxu0 }
 0x19e   : > { %v2271_v28 = vmul.f32 %v4974_v59, %v3676_v60  ;;  %v2400_v3 = vrot.slane %v4999_v17, 7  ;;  %v2497_v12 = vrot.slane %v5031_v29, 1  ;;  %v2632_v39 = vmul.f32 %v3641_v45, %v4999_v17  ;;  %5887 = vst [vmem:[#allocation7_spill] sm:$0xff] %v5063_v2 }
 0x19f   : > { %v2929_v35 = vmax.f32 %v2897_v38, 0.0  ;;  %v2731_v58 = vadd.f32 %v2699_v34, %v2663_v55  ;;  %vm1477_vm15 = vcmp.gt.s32.totalorder %v1241_v18, 0  ;;  %v3286_v57 = vunpack.c.l.bf16 %v5039_v25 }
 0x1a0   : > { %v1638_v9 = vsel %vm1477_vm15, %v4870_v41, 0.0  ;;  %v2035_v6 = vsel %vm1477_vm15, %v4970_v43, 0.0  ;;  %v5057_v63 = vsel %vm1581_vm3, %v2399_v27, %v2400_v3  ;;  %v5061_v16 = vsel %vm1678_vm5, %v2496_v13, %v2497_v12 }
 0x1a1   : > { %3015 = vrot.lane.b32.xlu0 %v2929_v35, %s3463_s13  ;;  %v2763_v7 = vadd.f32 %v2731_v58, %v2334_v36  ;;  %v1771_v46 = vmul.f32 %v3604_v30, %v1638_v9  ;;  %v2167_v40 = vmul.f32 %v3662_v54, %v2035_v6  ;;  %v2464_v41 = vsel %vm1477_vm15, %v5057_v63, 0.0 }
 0x1a2   : > { %v2596_v1 = vmul.f32 %v3655_v51, %v2464_v41  ;;  %v2700_v27 = vmul.f32 %v4689_v53, %v5061_v16  ;;  %v1062_v55 = vadd.s32 200, %v3590_v22  ;;  %v1772_v13 = vmul.f32 %v4919_v24, %v3604_v30  ;;  %v5082_v41 = vpop.f32.mrf.mxu0 }
 0x1a3   : > { %v2802_v38 = vadd.f32 %v4749_v61, %v2763_v7  ;;  %v1839_v34 = vadd.f32 %v1807_v20, %v1771_v46  ;;  %v2235_v36 = vadd.f32 %v2203_v62, %v2167_v40  ;;  %v1808_v18 = vmul.f32 %v4832_v15, %v3612_v32  ;;  %5888 = vst [vmem:[#allocation10_spill] sm:$0xff] %v5082_v41  ;;  %v5084_v7 = vld [vmem:[#allocation2 + $0xf0] sm:$0xff] }
 0x1a4   : > { %v2664_v35 = vadd.f32 %v2632_v39, %v2596_v1  ;;  %v1248_v58 = vand.u32 15, %v1062_v55  ;;  %v2168_v9 = vmul.f32 %v5014_v31, %v3662_v54  ;;  %v2204_v6 = vmul.f32 %v4935_v47, %v3639_v44 }
 0x1a5   : > { %v2898_v2 = vadd.f32 %v3283_v0, %v2802_v38  ;;  %v1907_v48 = vadd.f32 %v1875_v33, %v1839_v34  ;;  %v2303_v24 = vadd.f32 %v2271_v28, %v2235_v36  ;;  %v1840_v23 = vadd.f32 %v1808_v18, %v1772_v13 }
 0x1a6   : > { %v2732_v20 = vadd.f32 %v2700_v27, %v2664_v35  ;;  %vm5086_vm0 = vcmp.lt.s32.totalorder %v1248_v58, 15  ;;  %v2236_v15 = vadd.f32 %v2204_v6, %v2168_v9  ;;  %v2401_v39 = vrot.slane %v5031_v29, 7 }
 0x1a7   : > { %v2930_v46 = vmax.f32 %v2898_v2, 0.0  ;;  %v2335_v40 = vadd.f32 %v2303_v24, %v1907_v48  ;;  %v1736_v1 = vsel %vm5086_vm0, %v4923_v11, 0.0  ;;  %v2132_v0 = vsel %vm5086_vm0, %v5026_v49, 0.0  ;;  %v5104_v2 = vpop.f32.mrf.mxu0 }
 0x1a8   : > { %v1876_v33 = vmul.f32 %v3653_v50, %v1736_v1  ;;  %v2272_v28 = vmul.f32 %v3676_v60, %v2132_v0  ;;  %v5101_v27 = vsel %vm1581_vm3, %v2400_v3, %v2401_v39  ;;  %v2498_v55 = vrot.slane %v5084_v7, 1  ;;  %5891 = vst [vmem:[#allocation11_spill] sm:$0xff] %v5104_v2 }
 0x1a9   : > { %3017 = vrot.lane.b32.xlu1 %v2930_v46, %s3463_s13  ;;  %v2764_v48 = vadd.f32 %v2732_v20, %v2335_v40  ;;  %v2597_v11 = vmul.f32 %v3655_v51, %v5101_v27  ;;  %v2633_v13 = vmul.f32 %v3641_v45, %v5031_v29  ;;  %v3287_v38 = vunpack.c.h.bf16 %v5039_v25  ;;  %v5123_v25 = vld [vmem:[#allocation2 + $0xf8] sm:$0xff] }
 0x1aa   : > { %v1908_v34 = vadd.f32 %v1876_v33, %v1840_v23  ;;  %v2304_v36 = vadd.f32 %v2272_v28, %v2236_v15  ;;  %v5114_v3 = vsel %vm1678_vm5, %v2497_v12, %v2498_v55  ;;  %v1063_v18 = vadd.s32 208, %v3590_v22  ;;  %v5128_v15 = vpop.f32.mrf.mxu0 }
 0x1ab   : > { %v2803_v35 = vadd.f32 %v4749_v61, %v2764_v48  ;;  %v2561_v58 = vsel %vm5086_vm0, %v5114_v3, 0.0  ;;  %v2665_v9 = vadd.f32 %v2633_v13, %v2597_v11  ;;  %v1809_v6 = vmul.f32 %v4899_v42, %v3612_v32  ;;  %5892 = vst [vmem:[#allocation9_spill] sm:$0xff] %v5128_v15 }
 0x1ac   : > { %v2336_v23 = vadd.f32 %v2304_v36, %v1908_v34  ;;  %v2701_v24 = vmul.f32 %v4689_v53, %v2561_v58  ;;  %v1255_v12 = vand.u32 15, %v1063_v18  ;;  %v1877_v20 = vmul.f32 %v4974_v59, %v3653_v50  ;;  %v5141_v59 = vld [vmem:[%s3626_s23 + $0x68] sm:$0xff]  }
 0x1ad   : > { %v2899_v46 = vadd.f32 %v3286_v57, %v2803_v35  ;;  %v2205_v62 = vmul.f32 %v4999_v17, %v3639_v44  ;;  %v2273_v40 = vmul.f32 %v5061_v16, %v3676_v60  ;;  %v2402_v42 = vrot.slane %v5084_v7, 7  ;;  %v5152_v35 = vpop.f32.mrf.mxu0 }
 0x1ae   : > { %v2733_v1 = vadd.f32 %v2701_v24, %v2665_v9  ;;  %vm1479_vm1 = vcmp.gt.s32.totalorder %v1255_v12, 0  ;;  %v5136_v0 = vrot.slane %v5123_v25, 1  ;;  %v2634_v33 = vmul.f32 %v3641_v45, %v5084_v7  ;;  %5893 = vst [vmem:[#allocation15_spill] sm:$0xff] %v5152_v35 }
 0x1af   : > { %v2931_v28 = vmax.f32 %v2899_v46, 0.0  ;;  %v1640_v57 = vsel %vm1479_vm1, %v4970_v43, 0.0  ;;  %v2037_v48 = vsel %vm1479_vm1, %v5057_v63, 0.0  ;;  %v5147_v11 = vsel %vm1581_vm3, %v2401_v39, %v2402_v42 }
 0x1b0   : > { %v2765_v13 = vadd.f32 %v2733_v1, %v2336_v23  ;;  %v1773_v34 = vmul.f32 %v3604_v30, %v1640_v57  ;;  %v2169_v36 = vmul.f32 %v3662_v54, %v2037_v48  ;;  %v2466_v18 = vsel %vm1479_vm1, %v5147_v11, 0.0 }
 0x1b1   : > { %3019 = vrot.lane.b32.xlu0 %v2931_v28, %s3463_s13  ;;  %v5158_v43 = vsel %vm1678_vm5, %v2498_v55, %v5136_v0  ;;  %v2598_v58 = vmul.f32 %v3655_v51, %v2466_v18  ;;  %v3290_v39 = vunpack.c.l.bf16 %v5141_v59  ;;  %v1064_v9 = vadd.s32 216, %v3590_v22 }
 0x1b2   : > { %v2804_v23 = vadd.f32 %v4749_v61, %v2765_v13  ;;  %v1841_v24 = vadd.f32 %v1809_v6, %v1773_v34  ;;  %v2237_v12 = vadd.f32 %v2205_v62, %v2169_v36  ;;  %v2702_v46 = vmul.f32 %v4689_v53, %v5158_v43  ;;  %v5172_v13 = vpop.f32.mrf.mxu0  ;;  %v5180_v34 = vld [vmem:[#allocation2 + $0x100] sm:$0xff] }
 0x1b3   : > { %v2666_v1 = vadd.f32 %v2634_v33, %v2598_v58  ;;  %v1262_v28 = vand.u32 15, %v1064_v9  ;;  %v1774_v57 = vmul.f32 %v5014_v31, %v3604_v30  ;;  %v1810_v55 = vmul.f32 %v4935_v47, %v3612_v32  ;;  %5894 = vst [vmem:[#allocation16_spill] sm:$0xff] %v5172_v13 }
 0x1b4   : > { %v2900_v48 = vadd.f32 %v3287_v38, %v2804_v23  ;;  %v1909_v18 = vadd.f32 %v1877_v20, %v1841_v24  ;;  %v2305_v35 = vadd.f32 %v2273_v40, %v2237_v12  ;;  %v2170_v15 = vmul.f32 %v5101_v27, %v3662_v54 }
 0x1b5   : > { %v2734_v6 = vadd.f32 %v2702_v46, %v2666_v1  ;;  %vm5174_vm4 = vcmp.lt.s32.totalorder %v1262_v28, 15  ;;  %v1842_v33 = vadd.f32 %v1810_v55, %v1774_v57  ;;  %v2206_v31 = vmul.f32 %v5031_v29, %v3639_v44  ;;  %v5198_v46 = vpop.f32.mrf.mxu0 }
 0x1b6   : > { %v2932_v47 = vmax.f32 %v2900_v48, 0.0  ;;  %v2337_v38 = vadd.f32 %v2305_v35, %v1909_v18  ;;  %v1738_v20 = vsel %vm5174_vm4, %v5026_v49, 0.0  ;;  %v2134_v40 = vsel %vm5174_vm4, %v5114_v3, 0.0  ;;  %5897 = vst [vmem:[#allocation17_spill] sm:$0xff] %v5198_v46 }
 0x1b7   : > { %v1878_v36 = vmul.f32 %v3653_v50, %v1738_v20  ;;  %v2238_v58 = vadd.f32 %v2206_v31, %v2170_v15  ;;  %v2274_v9 = vmul.f32 %v3676_v60, %v2134_v40  ;;  %v5191_v23 = vrot.slane %v5123_v25, 7 }
 0x1b8   : > { %3021 = vrot.lane.b32.xlu1 %v2932_v47, %s3463_s13  ;;  %v2766_v24 = vadd.f32 %v2734_v6, %v2337_v38  ;;  %v2500_v35 = vrot.slane %v5180_v34, 1  ;;  %v2635_v49 = vmul.f32 %v3641_v45, %v5123_v25  ;;  %v3291_v12 = vunpack.c.h.bf16 %v5141_v59  ;;  %v5216_v6 = vld [vmem:[#allocation2 + $0x108] sm:$0xff] }
 0x1b9   : > { %v1910_v1 = vadd.f32 %v1878_v36, %v1842_v33  ;;  %v2306_v28 = vadd.f32 %v2274_v9, %v2238_v58  ;;  %v5203_v15 = vsel %vm1581_vm3, %v2402_v42, %v5191_v23  ;;  %v1065_v57 = vadd.s32 224, %v3590_v22 }
 0x1ba   : > { %v2805_v55 = vadd.f32 %v4749_v61, %v2766_v24  ;;  %v5210_v48 = vsel %vm1678_vm5, %v5136_v0, %v2500_v35  ;;  %v2599_v59 = vmul.f32 %v3655_v51, %v5203_v15  ;;  %v1811_v18 = vmul.f32 %v4999_v17, %v3612_v32  ;;  %v5226_v17 = vpop.f32.mrf.mxu0 }
 0x1bb   : > { %v2338_v33 = vadd.f32 %v2306_v28, %v1910_v1  ;;  %v2563_v42 = vsel %vm5174_vm4, %v5210_v48, 0.0  ;;  %v1269_v31 = vand.u32 15, %v1065_v57  ;;  %v1879_v47 = vmul.f32 %v5061_v16, %v3653_v50  ;;  %5898 = vst [vmem:[#allocation18_spill] sm:$0xff] %v5226_v17  ;;  %v5245_v28 = vld [vmem:[%s3626_s23 + $0x70] sm:$0xff]  }
 0x1bc   : > { %v2901_v38 = vadd.f32 %v3290_v39, %v2805_v55  ;;  %v2667_v20 = vadd.f32 %v2635_v49, %v2599_v59  ;;  %v2703_v40 = vmul.f32 %v4689_v53, %v2563_v42  ;;  %v2207_v36 = vmul.f32 %v5084_v7, %v3639_v44 }
 0x1bd   : > { %vm5228_vm6 = vcmp.gt.s32.totalorder %v1269_v31, 0  ;;  %v2275_v62 = vmul.f32 %v5158_v43, %v3676_v60  ;;  %v2404_v9 = vrot.slane %v5180_v34, 7  ;;  %v5236_v16 = vrot.slane %v5216_v6, 1 }
 0x1be   : > { %v2933_v39 = vmax.f32 %v2901_v38, 0.0  ;;  %v2735_v24 = vadd.f32 %v2703_v40, %v2667_v20  ;;  %v1642_v49 = vsel %vm5228_vm6, %v5057_v63, 0.0  ;;  %v2039_v1 = vsel %vm5228_vm6, %v5147_v11, 0.0  ;;  %v5267_v40 = vpop.permute.xlu1 %2975 }
 0x1bf   : > { %v1775_v57 = vmul.f32 %v3604_v30, %v1642_v49  ;;  %v2171_v55 = vmul.f32 %v3662_v54, %v2039_v1  ;;  %v5252_v59 = vsel %vm1581_vm3, %v5191_v23, %v2404_v9  ;;  %v5257_v42 = vsel %vm1678_vm5, %v2500_v35, %v5236_v16  ;;  %v5269_v49 = vpop.f32.mrf.mxu0 }
 0x1c0   : > { %3023 = vrot.lane.b32.xlu0 %v2933_v39, %s3463_s13  ;;  %v2767_v63 = vadd.f32 %v2735_v24, %v2338_v33  ;;  %v2468_v31 = vsel %vm5228_vm6, %v5252_v59, 0.0  ;;  %v2636_v38 = vmul.f32 %v3641_v45, %v5180_v34  ;;  %v2704_v20 = vmul.f32 %v4689_v53, %v5257_v42  ;;  %5901 = vst [vmem:[#allocation19_spill] sm:$0xff] %v5269_v49 }
 0x1c1   : > { %v1843_v1 = vadd.f32 %v1811_v18, %v1775_v57  ;;  %v2239_v35 = vadd.f32 %v2207_v36, %v2171_v55  ;;  %v2600_v17 = vmul.f32 %v3655_v51, %v2468_v31  ;;  %v3294_v33 = vunpack.c.l.bf16 %v5245_v28  ;;  %v5283_v31 = vld [vmem:[#allocation2 + $0x110] sm:$0xff]  ;;  %v5285_v49 = vpop.f32.mrf.mxu0 }
 0x1c2   : > { %v2806_v39 = vadd.f32 %v4749_v61, %v2767_v63  ;;  %v1066_v58 = vadd.s32 232, %v3590_v22  ;;  %v1776_v24 = vmul.f32 %v5101_v27, %v3604_v30  ;;  %v1812_v46 = vmul.f32 %v5031_v29, %v3612_v32  ;;  %5902 = vst [vmem:[#allocation20_spill] sm:$0xff] %v5285_v49 }
 0x1c3   : > { %v1911_v13 = vadd.f32 %v1879_v47, %v1843_v1  ;;  %v2307_v2 = vadd.f32 %v2275_v62, %v2239_v35  ;;  %v2668_v41 = vadd.f32 %v2636_v38, %v2600_v17  ;;  %v2172_v18 = vmul.f32 %v5203_v15, %v3662_v54  ;;  %v5297_v38 = vpop.permute.xlu0 %2973  ;;  %v5299_v1 = vpop.permute.xlu1 %2977  ;;  %v5341_v62 = vld [vmem:[#allocation2] sm:$0xff] }
 0x1c4   : > { %v2902_v36 = vadd.f32 %v3291_v12, %v2806_v39  ;;  %v1276_v57 = vand.u32 15, %v1066_v58  ;;  %v1844_v55 = vadd.f32 %v1812_v46, %v1776_v24  ;;  %v2208_v63 = vmul.f32 %v5123_v25, %v3639_v44 }
 0x1c5   : > { %v2339_v27 = vadd.f32 %v2307_v2, %v1911_v13  ;;  %v2736_v21 = vadd.f32 %v2704_v20, %v2668_v41  ;;  %v5288_v29 = vrot.slane %v5216_v6, 7  ;;  %v5777_v47 = vrot.slane %v5283_v31, 1 }
 0x1c6   : > { %v2934_v17 = vmax.f32 %v2902_v36, 0.0  ;;  %vm5291_vm7 = vcmp.lt.s32.totalorder %v1276_v57, 15  ;;  %v2240_v12 = vadd.f32 %v2208_v63, %v2172_v18  ;;  %v2637_v46 = vmul.f32 %v3641_v45, %v5216_v6 }
 0x1c7   : > { %v2768_v2 = vadd.f32 %v2736_v21, %v2339_v27  ;;  %v1740_v41 = vsel %vm5291_vm7, %v5114_v3, 0.0  ;;  %v2136_v13 = vsel %vm5291_vm7, %v5210_v48, 0.0  ;;  %v5310_v20 = vsel %vm1581_vm3, %v2404_v9, %v5288_v29  ;;  %v5322_v48 = vpop.f32.mrf.mxu0 }
 0x1c8   : > { %3025 = vrot.lane.b32.xlu1 %v2934_v17, %s3463_s13  ;;  %v1880_v35 = vmul.f32 %v3653_v50, %v1740_v41  ;;  %v2276_v39 = vmul.f32 %v3676_v60, %v2136_v13  ;;  %v2505_v21 = vsel %vm1678_vm5, %v5236_v16, %v5777_v47  ;;  %v2601_v3 = vmul.f32 %v3655_v51, %v5310_v20  ;;  %v5330_v17 = vpop.permute.xlu0 %2979 }
 0x1c9   : > { %5905 = vst [vmem:[#allocation21_spill] sm:$0xff] %v5322_v48  ;;  %v2807_v9 = vadd.f32 %v4749_v61, %v2768_v2  ;;  %v2565_v58 = vsel %vm5291_vm7, %v2505_v21, 0.0  ;;  %v3295_v24 = vunpack.c.h.bf16 %v5245_v28  ;;  %v1073_v18 = vand.u32 15, %v3590_v22  ;;  %v5908_v2 = vld [vmem:[#allocation3_spill] sm:$0xff]  ;;  %v5350_v21 = vpop.permute.xlu1 %2981 }
 0x1ca   : > { %v1912_v36 = vadd.f32 %v1880_v35, %v1844_v55  ;;  %v2308_v57 = vadd.f32 %v2276_v39, %v2240_v12  ;;  %v2669_v63 = vadd.f32 %v2637_v46, %v2601_v3  ;;  %v2705_v27 = vmul.f32 %v4689_v53, %v2565_v58  ;;  %v5348_v39 = vld [vmem:[#allocation2 + $0x118] sm:$0xff]  ;;  %v5352_v3 = vpop.f32.mrf.mxu0 }
 0x1cb   : > { %v2903_v41 = vadd.f32 %v3294_v33, %v2807_v9  ;;  %vm5332_vm8 = vcmp.gt.s32.totalorder %v1073_v18, 0  ;;  %v5909_v47 = vrot.slane %v5908_v2, 7  ;;  %v5778_v55 = vrot.slane %v5341_v62, 1  ;;  %5910 = vst [vmem:[#allocation3_spill] sm:$0xff] %v5352_v3  ;;  %v5368_v2 = vld [vmem:[#allocation2 + $0x10] sm:$0xff]  ;;  %v5916_v3 = vld [vmem:[#allocation12_spill] sm:$0xff] }
 0x1cc   : > { %v2340_v12 = vadd.f32 %v2308_v57, %v1912_v36  ;;  %v2737_v46 = vadd.f32 %v2705_v27, %v2669_v63  ;;  %v1783_v33 = vmul.f32 %v5341_v62, %v3612_v32  ;;  %v5913_v36 = vld [vmem:[#allocation13_spill] sm:$0xff]  ;;  %v5917_v48 = vrot.slane %v5348_v39, 7 }
 0x1cd   : > { %v1613_v28 = vsel %vm1581_vm3, %v5191_v23, %v5909_v47  ;;  %v2935_v9 = vmax.f32 %v2903_v41, 0.0  ;;  %v5911_v23 = vld [vmem:[#allocation4_spill] sm:$0xff]  ;;  %v2010_v57 = vsel %vm1581_vm3, %v5288_v29, %v5913_v36 }
 0x1ce   : > { %v1614_v35 = vsel %vm5332_vm8, %v1613_v28, 0.0  ;;  %v5912_v47 = vrot.slane %v5911_v23, 1  ;;  %v2769_v63 = vadd.f32 %v2737_v46, %v2340_v12  ;;  %v2011_v41 = vsel %vm5332_vm8, %v2010_v57, 0.0  ;;  %v5914_v46 = vld [vmem:[#allocation14_spill] sm:$0xff]  ;;  %v5382_v57 = vld [vmem:[#allocation2 + $0x20] sm:$0xff] }
 0x1cf   : > { %v1747_v18 = vmul.f32 %v3604_v30, %v1614_v35  ;;  %v5779_v28 = vrot.slane %v5368_v2, 1  ;;  %3027 = vrot.lane.b32.xlu0 %v2935_v9, %s3463_s13  ;;  %v2143_v35 = vmul.f32 %v3662_v54, %v2011_v41  ;;  %v5389_v41 = vpop.f32.mrf.mxu0  ;;  %v5918_v49 = vrot.slane %v5382_v57, 1 }
 0x1d0   : > { %v1709_v58 = vsel %vm1678_vm5, %v5778_v55, %v5912_v47  ;;  %v2179_v47 = vmul.f32 %v5368_v2, %v3639_v44  ;;  %v2808_v12 = vadd.f32 %v4749_v61, %v2769_v63  ;;  %5915 = vst [vmem:[#allocation4_spill] sm:$0xff] %v5389_v41 }
 0x1d1   : > { %v1851_v27 = vmul.f32 %v3653_v50, %v1709_v58  ;;  %v1815_v23 = vadd.f32 %v1783_v33, %v1747_v18  ;;  %v2105_v58 = vsel %vm1678_vm5, %v5779_v28, %v5914_v46  ;;  %v2608_v33 = vmul.f32 %v5382_v57, %v3641_v45  ;;  %v5387_v18 = vpop.permute.xlu0 %2983 }
 0x1d2   : > { %v2211_v63 = vadd.f32 %v2179_v47, %v2143_v35  ;;  %v2247_v36 = vmul.f32 %v3676_v60, %v2105_v58  ;;  %v2439_v46 = vsel %vm1581_vm3, %v5917_v48, %v5916_v3  ;;  %v2904_v28 = vadd.f32 %v3295_v24, %v2808_v12  ;;  %v5412_v24 = vld [vmem:[%s3626_s23 + $0x78] sm:$0xff]  }
 0x1d3   : > { %v1883_v55 = vadd.f32 %v1851_v27, %v1815_v23  ;;  %v2440_v9 = vsel %vm5332_vm8, %v2439_v46, 0.0  ;;  %v2534_v41 = vsel %vm1678_vm5, %v5918_v49, %v3829_v26  ;;  %v1067_v27 = vadd.s32 240, %v3590_v22  ;;  %v5405_v23 = vpop.permute.xlu1 %2985  ;;  %v5418_v49 = vpop.f32.mrf.mxu0 }
 0x1d4   : > { %v2279_v35 = vadd.f32 %v2247_v36, %v2211_v63  ;;  %v2572_v47 = vmul.f32 %v3655_v51, %v2440_v9  ;;  %v2676_v58 = vmul.f32 %v4689_v53, %v2534_v41  ;;  %v1813_v48 = vmul.f32 %v5084_v7, %v3612_v32  ;;  %5919 = vst [vmem:[#allocation13_spill] sm:$0xff] %v5418_v49 }
 0x1d5   : > { %v2936_v13 = vmax.f32 %v2904_v28, 0.0  ;;  %v1283_v3 = vand.u32 15, %v1067_v27  ;;  %v1881_v12 = vmul.f32 %v5158_v43, %v3653_v50  ;;  %v2209_v26 = vmul.f32 %v5180_v34, %v3639_v44 }
 0x1d6   : > { %v2311_v36 = vadd.f32 %v2279_v35, %v1883_v55  ;;  %v2640_v63 = vadd.f32 %v2608_v33, %v2572_v47  ;;  %v2277_v53 = vmul.f32 %v5257_v42, %v3676_v60  ;;  %v2406_v9 = vrot.slane %v5283_v31, 7  ;;  %v5432_v55 = vpop.permute.xlu0 %2987 }
 0x1d7   : > { %3029 = vrot.lane.b32.xlu1 %v2936_v13, %s3463_s13  ;;  %vm5424_vm9 = vcmp.gt.s32.totalorder %v1283_v3, 0  ;;  %v2503_v43 = vrot.slane %v5348_v39, 1  ;;  %v2638_v34 = vmul.f32 %v3641_v45, %v5283_v31  ;;  %v5451_v13 = vpop.permute.xlu1 %2989  ;;  %v5453_v3 = vpop.f32.mrf.mxu0  ;;  %v1068_v7 = vadd.s32 248, %v3590_v22  ;;  %v3453_v22 = vld [vmem:[%s5753_s7] ss:$0 sm:$0xff] }
 0x1d8   : > { %v2708_v33 = vadd.f32 %v2676_v58, %v2640_v63  ;;  %v1644_v42 = vsel %vm5424_vm9, %v5147_v11, 0.0  ;;  %v2041_v41 = vsel %vm5424_vm9, %v5252_v59, 0.0  ;;  %v2409_v46 = vsel %vm1581_vm3, %v5288_v29, %v2406_v9  ;;  %5923 = vst [vmem:[#allocation14_spill] sm:$0xff] %v5453_v3  ;;  %v3452_v29 = vld [vmem:[%s5752_s6 + $0x8] ss:$0 sm:$0xff] }
 0x1d9   : > { %v1777_v27 = vmul.f32 %v3604_v30, %v1644_v42  ;;  %v2173_v35 = vmul.f32 %v3662_v54, %v2041_v41  ;;  %v2470_v47 = vsel %vm5424_vm9, %v2409_v46, 0.0  ;;  %v5922_v58 = vrot.slane %v5283_v31, 1 }
 0x1da   : > { %v2740_v59 = vadd.f32 %v2708_v33, %v2311_v36  ;;  %v2602_v63 = vmul.f32 %v3655_v51, %v2470_v47  ;;  %v5924_v31 = vrot.slane %v5341_v62, 1  ;;  %v1778_v36 = vmul.f32 %v5203_v15, %v3604_v30  ;;  %v5479_v30 = vpop.f32.mrf.mxu0 }
 0x1db   : > { %v2504_v11 = vsel %vm1678_vm5, %v5922_v58, %v2503_v43  ;;  %v1845_v41 = vadd.f32 %v1813_v48, %v1777_v27  ;;  %v2241_v46 = vadd.f32 %v2209_v26, %v2173_v35  ;;  %v1290_v28 = vand.u32 15, %v1068_v7  ;;  %v5477_v26 = vpop.permute.xlu0 %2991  ;;  %v5504_v35 = vld [vmem:[%s5751_s5] ss:$0 sm:$0xff] }
 0x1dc   : > { %v2706_v42 = vmul.f32 %v3452_v29, %v2504_v11  ;;  %v1710_v58 = vsel %vm1678_vm5, %v5136_v0, %v5924_v31  ;;  %v2779_v33 = vadd.f32 %v4749_v61, %v2740_v59  ;;  %v2670_v47 = vadd.f32 %v2638_v34, %v2602_v63  ;;  %v5512_v59 = vpop.f32.mrf.mxu0 }
 0x1dd   : > { %v1814_v11 = vmul.f32 %v5123_v25, %v3612_v32  ;;  %v1913_v3 = vadd.f32 %v1881_v12, %v1845_v41  ;;  %v2309_v49 = vadd.f32 %v2277_v53, %v2241_v46  ;;  %v5925_v48 = vrot.slane %v5368_v2, 1  ;;  %v5493_v53 = vpop.permute.xlu1 %2993  ;;  %v5932_v25 = vld [vmem:[#allocation5_spill] sm:$0xff] }
 0x1de   : > { %v2174_v0 = vmul.f32 %v5310_v20, %v3662_v54  ;;  %v5926_v61 = vunpack.c.l.bf16 %v3658_v52  ;;  %v2738_v32 = vadd.f32 %v2706_v42, %v2670_v47  ;;  %vm5483_vm10 = vcmp.lt.s32.totalorder %v1290_v28, 15 }
 0x1df   : > { %v2106_v62 = vsel %vm1678_vm5, %v5236_v16, %v5925_v48  ;;  %v1846_v2 = vadd.f32 %v1814_v11, %v1778_v36  ;;  %v2341_v12 = vadd.f32 %v2309_v49, %v1913_v3  ;;  %v1742_v16 = vsel %vm5483_vm10, %v1710_v58, 0.0  ;;  %v5525_v46 = vpop.permute.xlu0 %2995 }
 0x1e0   : > { %v2875_v15 = vadd.f32 %v5926_v61, %v2779_v33  ;;  %v2138_v54 = vsel %vm5483_vm10, %v2106_v62, 0.0  ;;  %v2210_v20 = vmul.f32 %v5216_v6, %v3639_v44  ;;  %v1882_v34 = vmul.f32 %v3653_v50, %v1742_v16  ;;  %v5935_v16 = vld [vmem:[#allocation7_spill] sm:$0xff] }
 0x1e1   : > { %v2278_v28 = vmul.f32 %v3676_v60, %v2138_v54  ;;  %v5929_v27 = vrot.slane %v5348_v39, 7  ;;  %v2770_v3 = vadd.f32 %v2738_v32, %v2341_v12  ;;  %v5930_v6 = vrot.slane %v5382_v57, 1  ;;  %v5542_v11 = vpop.permute.xlu1 %2997 }
 0x1e2   : > { %v2907_v52 = vmax.f32 %v2875_v15, 0.0  ;;  %v2242_v44 = vadd.f32 %v2210_v20, %v2174_v0  ;;  %v2639_v42 = vmul.f32 %v3641_v45, %v5348_v39  ;;  %v3299_v7 = vunpack.c.h.bf16 %v5412_v24 }
 0x1e3   : > { %v2408_v49 = vsel %vm1581_vm3, %v2406_v9, %v5929_v27  ;;  %v2535_v50 = vsel %vm1678_vm5, %v2503_v43, %v5930_v6  ;;  %v1914_v9 = vadd.f32 %v1882_v34, %v1846_v2  ;;  %v2809_v57 = vadd.f32 %v3453_v22, %v2770_v3  ;;  %v3000_v20 = vpop.permute.xlu0 %2999 }
 0x1e4   : > { %v2603_v60 = vmul.f32 %v3655_v51, %v2408_v49  ;;  %2971 = vrot.lane.b32.xlu0 %v2907_v52, %s3463_s13  ;;  %v2567_v63 = vsel %vm5483_vm10, %v2535_v50, 0.0  ;;  %v2310_v43 = vadd.f32 %v2278_v28, %v2242_v44  ;;  %v570_v41 = vadd.f32 %v4782_v14, %v5504_v35  ;;  %v5936_v44 = vld [vmem:[#allocation10_spill] sm:$0xff] }
 0x1e5   : > { %v2707_v51 = vmul.f32 %v3452_v29, %v2567_v63  ;;  %v562_v39 = vadd.f32 %v5504_v35, %v4805_v5  ;;  %v573_v31 = vadd.f32 %v4834_v8, %v5504_v35  ;;  %v565_v29 = vadd.f32 %v5504_v35, %v4858_v56  ;;  %v5544_v5 = vpop.f32.mrf.mxu0  ;;  %v3002_v50 = vpop.permute.xlu1 %3001  ;;  %v5938_v63 = vld [vmem:[#allocation9_spill] sm:$0xff] }
 0x1e6   : > { %v2671_v45 = vadd.f32 %v2639_v42, %v2603_v60  ;;  %v5931_v14 = vunpack.c.l.bf16 %v5412_v24  ;;  %v2342_v36 = vadd.f32 %v2310_v43, %v1914_v9  ;;  %v690_v33 = vmax.f32 %v570_v41, 0.0 }
 0x1e7   : > { %v586_v47 = vadd.f32 %v4886_v4, %v5504_v35  ;;  %v688_v48 = vmax.f32 %v562_v39, 0.0  ;;  %v691_v62 = vmax.f32 %v573_v31, 0.0  ;;  %v689_v56 = vmax.f32 %v565_v29, 0.0  ;;  %v5580_v52 = vpop.f32.mrf.mxu0 }
 0x1e8   : > { %v2905_v58 = vadd.f32 %v5931_v14, %v2809_v57  ;;  %v2739_v8 = vadd.f32 %v2707_v51, %v2671_v45  ;;  %723 = vst.msk [vmem:[%s5530_s11 + $0x10] sm:$0xff] %vm720_vm2, %v690_v33  ;;  %vm3067_vm3 = vcmask 31760   ;;  %v578_v4 = vadd.f32 %v5504_v35, %v4908_v37  ;;  %v5941_v51 = vld [vmem:[#allocation17_spill] sm:$0xff]  ;;  %v5942_v45 = vld [vmem:[#allocation18_spill] sm:$0xff] }
 0x1e9   : > { %v694_v0 = vmax.f32 %v586_v47, 0.0  ;;  %721 = vst.msk [vmem:[%s5530_s11] sm:$0xff] %vm720_vm2, %v688_v48  ;;  %724 = vst.msk [vmem:[%s5530_s11 + $0x18] sm:$0xff] %vm720_vm2, %v691_v62  ;;  %v589_v15 = vadd.f32 %v4940_v10, %v5504_v35  ;;  %v581_v32 = vadd.f32 %v5504_v35, %v4964_v19  ;;  %v602_v37 = vadd.f32 %v5932_v25, %v5504_v35  ;;  %v5933_v10 = vld [vmem:[#allocation6_spill] sm:$0xff]  ;;  %v5934_v19 = vld [vmem:[#allocation8_spill] sm:$0xff]  ;;  %v3004_v47 = vpop.permute.xlu0 %3003 }
 0x1ea   : > { %v2937_v24 = vmax.f32 %v2905_v58, 0.0  ;;  %v2771_v61 = vadd.f32 %v2739_v8, %v2342_v36  ;;  %722 = vst.msk [vmem:[%s5530_s11 + $0x8] sm:$0xff] %vm720_vm2, %v689_v56  ;;  %v692_v2 = vmax.f32 %v578_v4, 0.0  ;;  %v605_v12 = vadd.f32 %v5934_v19, %v5504_v35  ;;  %v5945_v8 = vld [vmem:[#allocation21_spill] sm:$0xff]  ;;  %v5946_v62 = vld [vmem:[#allocation3_spill] sm:$0xff]  ;;  %v5949_v25 = vld [vmem:[#allocation14_spill] sm:$0xff] }
 0x1eb   : > { %3070 = vst.msk [vmem:[%s5530_s11 + $0x10] sm:$0xff] %vm3067_vm3, %v5267_v40  ;;  %3069 = vst.msk [vmem:[%s5530_s11 + $0x8] sm:$0xff] %vm3067_vm3, %v5297_v38  ;;  %v594_v40 = vadd.f32 %v5504_v35, %v5933_v10  ;;  %v597_v54 = vadd.f32 %v5504_v35, %v5935_v16  ;;  %v695_v34 = vmax.f32 %v589_v15, 0.0  ;;  %v693_v28 = vmax.f32 %v581_v32, 0.0  ;;  %v5948_v15 = vld [vmem:[#allocation13_spill] sm:$0xff] }
 0x1ec   : > { %3031 = vrot.lane.b32.xlu0 %v2937_v24, %s3463_s13  ;;  %727 = vst.msk [vmem:[%s5530_s11 + $0x30] sm:$0xff] %vm720_vm2, %v694_v0  ;;  %v2810_v38 = vadd.f32 %v3453_v22, %v2771_v61  ;;  %725 = vst.msk [vmem:[%s5530_s11 + $0x20] sm:$0xff] %vm720_vm2, %v692_v2  ;;  %v699_v49 = vmax.f32 %v605_v12, 0.0  ;;  %v618_v6 = vadd.f32 %v5936_v44, %v5504_v35  ;;  %v5939_v22 = vld [vmem:[#allocation15_spill] sm:$0xff]  ;;  %v5947_v24 = vld [vmem:[#allocation4_spill] sm:$0xff] }
 0x1ed   : > { %3071 = vst.msk [vmem:[%s5530_s11 + $0x18] sm:$0xff] %vm3067_vm3, %v5299_v1  ;;  %v698_v1 = vmax.f32 %v602_v37, 0.0  ;;  %3074 = vst.msk [vmem:[%s5530_s11 + $0x30] sm:$0xff] %vm3067_vm3, %v5387_v18  ;;  %v696_v27 = vmax.f32 %v594_v40, 0.0  ;;  %v697_v3 = vmax.f32 %v597_v54, 0.0  ;;  %v5937_v18 = vld [vmem:[#allocation11_spill] sm:$0xff]  ;;  %v621_v42 = vadd.f32 %v5938_v63, %v5504_v35  ;;  %v3006_v61 = vpop.permute.xlu1 %3005 }
 0x1ee   : > { %v2906_v60 = vadd.f32 %v3299_v7, %v2810_v38  ;;  %728 = vst.msk [vmem:[%s5530_s11 + $0x38] sm:$0xff] %vm720_vm2, %v695_v34  ;;  %726 = vst.msk [vmem:[%s5530_s11 + $0x28] sm:$0xff] %vm720_vm2, %v693_v28  ;;  %v610_v9 = vadd.f32 %v5504_v35, %v5937_v18  ;;  %v613_v57 = vadd.f32 %v5504_v35, %v5939_v22  ;;  %v5940_v7 = vld [vmem:[#allocation16_spill] sm:$0xff] }
 0x1ef   : > { %3072 = vst.msk [vmem:[%s5530_s11 + $0x20] sm:$0xff] %vm3067_vm3, %v5330_v17  ;;  %3073 = vst.msk [vmem:[%s5530_s11 + $0x28] sm:$0xff] %vm3067_vm3, %v5350_v21  ;;  %v702_v17 = vmax.f32 %v618_v6, 0.0  ;;  %v634_v43 = vadd.f32 %v5940_v7, %v5504_v35  ;;  %v626_v41 = vadd.f32 %v5504_v35, %v5941_v51  ;;  %v637_v39 = vadd.f32 %v5942_v45, %v5504_v35  ;;  %v3382_v21 = vpop.f32.mrf.mxu0 }
 0x1f0   : > { %731 = vst.msk [vmem:[%s5530_s11 + $0x50] sm:$0xff] %vm720_vm2, %v698_v1  ;;  %729 = vst.msk [vmem:[%s5530_s11 + $0x40] sm:$0xff] %vm720_vm2, %v696_v27  ;;  %v2938_v31 = vmax.f32 %v2906_v60, 0.0  ;;  %v701_v29 = vmax.f32 %v613_v57, 0.0  ;;  %v642_v48 = vadd.f32 %v5504_v35, %v5945_v8  ;;  %v653_v56 = vadd.f32 %v5946_v62, %v5504_v35 }
 0x1f1   : > { %732 = vst.msk [vmem:[%s5530_s11 + $0x58] sm:$0xff] %vm720_vm2, %v699_v49  ;;  %730 = vst.msk [vmem:[%s5530_s11 + $0x48] sm:$0xff] %vm720_vm2, %v697_v3  ;;  %v706_v14 = vmax.f32 %v634_v43, 0.0  ;;  %v704_v58 = vmax.f32 %v626_v41, 0.0  ;;  %v707_v36 = vmax.f32 %v637_v39, 0.0  ;;  %v645_v0 = vadd.f32 %v5504_v35, %v5947_v24  ;;  %v676_v2 = vpop.f32.mrf.mxu0 }
 0x1f2   : > { %3075 = vst.msk [vmem:[%s5530_s11 + $0x38] sm:$0xff] %vm3067_vm3, %v5405_v23  ;;  %3078 = vst.msk [vmem:[%s5530_s11 + $0x50] sm:$0xff] %vm3067_vm3, %v5477_v26  ;;  %v700_v23 = vmax.f32 %v610_v9, 0.0  ;;  %v703_v26 = vmax.f32 %v621_v42, 0.0  ;;  %3033 = vrot.lane.b32.xlu1 %v2938_v31, %s3463_s13  ;;  %v666_v32 = vadd.f32 %v5948_v15, %v5504_v35  ;;  %v669_v37 = vadd.f32 %v5479_v30, %v5504_v35 }
 0x1f3   : > { %3076 = vst.msk [vmem:[%s5530_s11 + $0x40] sm:$0xff] %vm3067_vm3, %v5432_v55  ;;  %3077 = vst.msk [vmem:[%s5530_s11 + $0x48] sm:$0xff] %vm3067_vm3, %v5451_v13  ;;  %v5943_v55 = vld [vmem:[#allocation19_spill] sm:$0xff]  ;;  %v5944_v13 = vld [vmem:[#allocation20_spill] sm:$0xff]  ;;  %v708_v10 = vmax.f32 %v642_v48, 0.0  ;;  %v711_v40 = vmax.f32 %v653_v56, 0.0  ;;  %v682_v30 = vadd.f32 %v5544_v5, %v5504_v35  ;;  %v685_v38 = vadd.f32 %v3382_v21, %v5504_v35 }
 0x1f4   : > { %3079 = vst.msk [vmem:[%s5530_s11 + $0x58] sm:$0xff] %vm3067_vm3, %v5493_v53  ;;  %v629_v33 = vadd.f32 %v5504_v35, %v5943_v55  ;;  %v650_v53 = vadd.f32 %v5944_v13, %v5504_v35  ;;  %v709_v19 = vmax.f32 %v645_v0, 0.0  ;;  %v714_v12 = vmax.f32 %v666_v32, 0.0 }
 0x1f5   : > { %735 = vst.msk [vmem:[%s5530_s11 + $0x70] sm:$0xff] %vm720_vm2, %v702_v17  ;;  %733 = vst.msk [vmem:[%s5530_s11 + $0x60] sm:$0xff] %vm720_vm2, %v700_v23  ;;  %v715_v54 = vmax.f32 %v669_v37, 0.0  ;;  %v677_v34 = vadd.f32 %v5504_v35, %v676_v2  ;;  %v3008_v5 = vpop.permute.xlu0 %3007  ;;  %v718_v1 = vmax.f32 %v682_v30, 0.0 }
 0x1f6   : > { %736 = vst.msk [vmem:[%s5530_s11 + $0x78] sm:$0xff] %vm720_vm2, %v703_v26  ;;  %734 = vst.msk [vmem:[%s5530_s11 + $0x68] sm:$0xff] %vm720_vm2, %v701_v29  ;;  %v705_v4 = vmax.f32 %v629_v33, 0.0 }
 0x1f7   : > { %3082 = vst.msk [vmem:[%s5530_s11 + $0x70] sm:$0xff] %vm3067_vm3, %v3000_v20  ;;  %3080 = vst.msk [vmem:[%s5530_s11 + $0x60] sm:$0xff] %vm3067_vm3, %v5525_v46  ;;  %v658_v46 = vadd.f32 %v5504_v35, %v5949_v25  ;;  %v661_v20 = vadd.f32 %v5504_v35, %v5512_v59  ;;  %v674_v59 = vadd.f32 %v5504_v35, %v5580_v52  ;;  %v719_v52 = vmax.f32 %v685_v38, 0.0 }
 0x1f8   : > { %739 = vst.msk [vmem:[%s5530_s11 + $0x90] sm:$0xff] %vm720_vm2, %v706_v14  ;;  %737 = vst.msk [vmem:[%s5530_s11 + $0x80] sm:$0xff] %vm720_vm2, %v704_v58  ;;  %v717_v49 = vmax.f32 %v677_v34, 0.0 }
 0x1f9   : > { %740 = vst.msk [vmem:[%s5530_s11 + $0x98] sm:$0xff] %vm720_vm2, %v707_v36  ;;  %738 = vst.msk [vmem:[%s5530_s11 + $0x88] sm:$0xff] %vm720_vm2, %v705_v4  ;;  %v712_v16 = vmax.f32 %v658_v46, 0.0  ;;  %v713_v28 = vmax.f32 %v661_v20, 0.0  ;;  %v716_v27 = vmax.f32 %v674_v59, 0.0 }
 0x1fa   : > { %3081 = vst.msk [vmem:[%s5530_s11 + $0x68] sm:$0xff] %vm3067_vm3, %v5542_v11  ;;  %3083 = vst.msk [vmem:[%s5530_s11 + $0x78] sm:$0xff] %vm3067_vm3, %v3002_v50  ;;  %v710_v11 = vmax.f32 %v650_v53, 0.0 }
 0x1fb   : > { %3084 = vst.msk [vmem:[%s5530_s11 + $0x80] sm:$0xff] %vm3067_vm3, %v3004_v47  ;;  %3085 = vst.msk [vmem:[%s5530_s11 + $0x88] sm:$0xff] %vm3067_vm3, %v3006_v61  ;;  %v3010_v35 = vpop.permute.xlu1 %3009 }
 0x1fc   : > { %743 = vst.msk [vmem:[%s5530_s11 + $0xb0] sm:$0xff] %vm720_vm2, %v710_v11  ;;  %741 = vst.msk [vmem:[%s5530_s11 + $0xa0] sm:$0xff] %vm720_vm2, %v708_v10 }
 0x1fd   : > { %744 = vst.msk [vmem:[%s5530_s11 + $0xb8] sm:$0xff] %vm720_vm2, %v711_v40  ;;  %742 = vst.msk [vmem:[%s5530_s11 + $0xa8] sm:$0xff] %vm720_vm2, %v709_v19 }
 0x1fe   : > { %747 = vst.msk [vmem:[%s5530_s11 + $0xd0] sm:$0xff] %vm720_vm2, %v714_v12  ;;  %745 = vst.msk [vmem:[%s5530_s11 + $0xc0] sm:$0xff] %vm720_vm2, %v712_v16 }
 0x1ff   : > { %748 = vst.msk [vmem:[%s5530_s11 + $0xd8] sm:$0xff] %vm720_vm2, %v715_v54  ;;  %746 = vst.msk [vmem:[%s5530_s11 + $0xc8] sm:$0xff] %vm720_vm2, %v713_v28 }
 0x200   : > { %3086 = vst.msk [vmem:[%s5530_s11 + $0x90] sm:$0xff] %vm3067_vm3, %v3008_v5  ;;  %3087 = vst.msk [vmem:[%s5530_s11 + $0x98] sm:$0xff] %vm3067_vm3, %v3010_v35 }
 0x201   : > { %751 = vst.msk [vmem:[%s5530_s11 + $0xf0] sm:$0xff] %vm720_vm2, %v718_v1  ;;  %749 = vst.msk [vmem:[%s5530_s11 + $0xe0] sm:$0xff] %vm720_vm2, %v716_v27 }
 0x202   : > { %752 = vst.msk [vmem:[%s5530_s11 + $0xf8] sm:$0xff] %vm720_vm2, %v719_v52  ;;  %750 = vst.msk [vmem:[%s5530_s11 + $0xe8] sm:$0xff] %vm720_vm2, %v717_v49 }
 0x204   : > { %v3012_v3 = vpop.permute.xlu0 %3011 }
 0x205   : > { %3088 = vst.msk [vmem:[%s5530_s11 + $0xa0] sm:$0xff] %vm3067_vm3, %v3012_v3 }
 0x20c   : > { %v3014_v44 = vpop.permute.xlu1 %3013 }
 0x20d   : > { %3089 = vst.msk [vmem:[%s5530_s11 + $0xa8] sm:$0xff] %vm3067_vm3, %v3014_v44 }
 0x213   : > { %v3016_v6 = vpop.permute.xlu0 %3015 }
 0x214   : > { %3090 = vst.msk [vmem:[%s5530_s11 + $0xb0] sm:$0xff] %vm3067_vm3, %v3016_v6 }
 0x21b   : > { %v3018_v50 = vpop.permute.xlu1 %3017 }
 0x21c   : > { %3091 = vst.msk [vmem:[%s5530_s11 + $0xb8] sm:$0xff] %vm3067_vm3, %v3018_v50 }
 0x223   : > { %v3020_v60 = vpop.permute.xlu0 %3019 }
 0x224   : > { %3092 = vst.msk [vmem:[%s5530_s11 + $0xc0] sm:$0xff] %vm3067_vm3, %v3020_v60 }
 0x22a   : > { %v3022_v18 = vpop.permute.xlu1 %3021 }
 0x22b   : > { %3093 = vst.msk [vmem:[%s5530_s11 + $0xc8] sm:$0xff] %vm3067_vm3, %v3022_v18 }
 0x232   : > { %v3024_v9 = vpop.permute.xlu0 %3023 }
 0x233   : > { %3094 = vst.msk [vmem:[%s5530_s11 + $0xd0] sm:$0xff] %vm3067_vm3, %v3024_v9 }
 0x23a   : > { %v3026_v63 = vpop.permute.xlu1 %3025 }
 0x23b   : > { %3095 = vst.msk [vmem:[%s5530_s11 + $0xd8] sm:$0xff] %vm3067_vm3, %v3026_v63 }
 0x241   : > { %v3028_v42 = vpop.permute.xlu0 %3027 }
 0x242   : > { %3096 = vst.msk [vmem:[%s5530_s11 + $0xe0] sm:$0xff] %vm3067_vm3, %v3028_v42 }
 0x249   : > { %v3030_v22 = vpop.permute.xlu1 %3029 }
 0x24a   : > { %3097 = vst.msk [vmem:[%s5530_s11 + $0xe8] sm:$0xff] %vm3067_vm3, %v3030_v22 }
 0x256   : > { %v2972_v57 = vpop.permute.xlu0 %2971 }
 0x257   : > { %3068 = vst.msk [vmem:[%s5530_s11] sm:$0xff] %vm3067_vm3, %v2972_v57 }
 0x25e   : > { %v3032_v17 = vpop.permute.xlu0 %3031 }
 0x25f   : > { %3098 = vst.msk [vmem:[%s5530_s11 + $0xf0] sm:$0xff] %vm3067_vm3, %v3032_v17 }
 0x264   : > { %v3034_v7 = vpop.permute.xlu1 %3033 }
 0x265   : > { %3099 = vst.msk [vmem:[%s5530_s11 + $0xf8] sm:$0xff] %vm3067_vm3, %v3034_v7 }
 0x266 PF: > { %s19_s30 = sadd.s32 1, %s3460_s30  }
 0x267   : > { %p16_p4 = scmp.ge.s32.totalorder %s19_s30, 4  }
 0x269   :  { %18 = sbr.rel (!%p16_p4) target bundleno = 1 (0x1), region = 92 }

</bundles_post_ra>
